<compile_context>
chip_gen: v7x
topology: tpu7x:2x2x1
jax: 0.10.0
libtpu: 0.0.40
codegen_flags: <defaults>
</compile_context>

<pallas_src>
import math
from functools import partial

import jax
import jax.numpy as jnp
from jax.experimental import pallas as pl
from jax.experimental.pallas import tpu as pltpu

EPS = 1e-5  # torch.nn.LayerNorm default


# ---------------------------------------------------------------------------
# small helpers
# ---------------------------------------------------------------------------
def _round_up(x, m):
    return (x + m - 1) // m * m


def _layernorm(x, g, b):
    mu = jnp.mean(x, axis=-1, keepdims=True)
    var = jnp.mean((x - mu) ** 2, axis=-1, keepdims=True)   # biased, like torch
    return (x - mu) * jax.lax.rsqrt(var + EPS) * g + b


def _gelu_exact(x):
    # torch.nn.GELU() default (approximate='none') = erf-based GELU
    return 0.5 * x * (1.0 + jax.lax.erf(x * (1.0 / math.sqrt(2.0))))


def _pick_kv_tile(T):
    """KV tile length for the blocked (online-softmax) attention loop."""
    if T <= 512:
        return T
    for tk in (512, 256, 128):
        if T % tk == 0:
            return tk
    return T


def _pad_vocab(V):
    return _round_up(V, 1024) if V >= 1024 else _round_up(V, 128)


def _pick_vocab_tile(Vp):
    return min(Vp, 1024)


def _vmem_limit_bytes():
    """~3/4 of physical VMEM, capped at 100 MiB (96 MiB v5e/v6e, 48 MiB v7x)."""
    try:
        cap = int(pltpu.get_tpu_info().vmem_capacity_bytes)
    except Exception:
        cap = 64 * 1024 * 1024
    return int(min(100 * 1024 * 1024, max(32 * 1024 * 1024, (cap * 3) // 4)))


# ---------------------------------------------------------------------------
# Pallas kernels
# ---------------------------------------------------------------------------
def gpt_stack_kernel(H, TK,
                     x_ref, bias_ref, lnfg_ref, lnfb_ref,
                     ln1g_ref, ln1b_ref, wqkv_ref, bqkv_ref,
                     wo_ref, bo_ref, ln2g_ref, ln2b_ref,
                     w1_ref, b1_ref, w2_ref, b2_ref,
                     out_ref, carry_ref):
    """Grid = (batch, layer).  One step: one GPTBlock on one batch's (T, E) rows.

    carry_ref (T, E) f32 scratch holds the residual stream for the current
    batch; the ONLY HBM output is the final-LayerNorm'ed last position,
    written once at l == L-1.
    """
    l = pl.program_id(1)
    L = pl.num_programs(1)
    T, E = carry_ref.shape
    D = E // H
    nkv = T // TK            # wrapper guarantees T % TK == 0

    @pl.when(l == 0)
    def _init():
        carry_ref[...] = x_ref[0]

    x = carry_ref[...]                                        # (T, E) f32

    # ---------------- causal self-attention branch ----------------
    xn = _layernorm(x, ln1g_ref[0], ln1b_ref[0])
    qkv = jnp.dot(xn.astype(jnp.bfloat16), wqkv_ref[0],
                  preferred_element_type=jnp.float32) + bqkv_ref[0]   # (T, 3E)

    scale = 1.0 / math.sqrt(D)
    q = qkv[:, 0 * E:1 * E] * scale          # fold 1/sqrt(D) into q
    k = qkv[:, 1 * E:2 * E]
    v = qkv[:, 2 * E:3 * E]

    # Head-major (H, T, D) views via lane slices + stack.
    # TODO(synk): collapse to a single relayout (pltpu.einshape 't(hd)->htd')
    # once verified on all target Mosaic versions; the slice/stack form is the
    # proven-lowering path.
    qh = jnp.stack([q[:, h * D:(h + 1) * D] for h in range(H)], axis=0).astype(jnp.bfloat16)
    kh = jnp.stack([k[:, h * D:(h + 1) * D] for h in range(H)], axis=0).astype(jnp.bfloat16)
    vh = jnp.stack([v[:, h * D:(h + 1) * D] for h in range(H)], axis=0).astype(jnp.bfloat16)

    # Blocked KV loop with online softmax: working set (H, T, TK), never (H,T,T).
    m = jnp.full((H, T, 1), -jnp.inf, dtype=jnp.float32)
    lsum = jnp.zeros((H, T, 1), dtype=jnp.float32)
    acc = jnp.zeros((H, T, D), dtype=jnp.float32)
    for j in range(nkv):                                      # static trip count
        kb = kh[:, j * TK:(j + 1) * TK, :]
        vb = vh[:, j * TK:(j + 1) * TK, :]
        bb = bias_ref[:, j * TK:(j + 1) * TK]                 # precomputed 0/-1e30
        s = jnp.einsum('hqd,hkd->hqk', qh, kb,
                       preferred_element_type=jnp.float32)    # (H, T, TK)
        s = s + bb[None, :, :]
        m_new = jnp.maximum(m, jnp.max(s, axis=-1, keepdims=True))
        alpha = jnp.exp(m - m_new)
        p = jnp.exp(s - m_new)                                # f32 (v5e-safe)
        lsum = alpha * lsum + jnp.sum(p, axis=-1, keepdims=True)
        acc = alpha * acc + jnp.einsum('hqk,hkd->hqd', p.astype(jnp.bfloat16), vb,
                                       preferred_element_type=jnp.float32)
        m = m_new
    o = acc * pl.reciprocal(lsum, approx=True)                # (H, T, D) f32

    # concat heads -> single full-K output projection
    ctx = jnp.concatenate([o[h] for h in range(H)], axis=-1)  # (T, E)
    attn = jnp.dot(ctx.astype(jnp.bfloat16), wo_ref[0],
                   preferred_element_type=jnp.float32) + bo_ref[0]
    x = x + attn

    # ---------------- feed-forward branch ----------------
    xn2 = _layernorm(x, ln2g_ref[0], ln2b_ref[0])
    h1 = jnp.dot(xn2.astype(jnp.bfloat16), w1_ref[0],
                 preferred_element_type=jnp.float32) + b1_ref[0]
    h1 = _gelu_exact(h1)
    h2 = jnp.dot(h1.astype(jnp.bfloat16), w2_ref[0],
                 preferred_element_type=jnp.float32) + b2_ref[0]
    x = x + h2

    carry_ref[...] = x

    # Only output: final LN of the LAST position, written once per batch.
    @pl.when(l == L - 1)
    def _finalize():
        last = _layernorm(x[T - 1:T, :], lnfg_ref[...], lnfb_ref[...])   # (1, E)
        out_ref[0] = last


def lm_head_kernel(x_ref, wh_ref, bh_ref, out_ref):
    """lm_head on pre-normalized last-position states; vocab tiled by the grid."""
    out_ref[...] = (jnp.dot(x_ref[...].astype(jnp.bfloat16), wh_ref[...],
                            preferred_element_type=jnp.float32) + bh_ref[...])


# ---------------------------------------------------------------------------
# wrappers (pallas_call plumbing)
# ---------------------------------------------------------------------------
def run_blocks(x, bias, stk, lnf_g, lnf_b, H, vmem_limit):
    """x: (B, T, E) f32.  Returns (B, 1, E) final-LN'ed last-position states."""
    B, T, E = x.shape
    L = stk["w_qkv"].shape[0]
    F = stk["w1"].shape[-1]
    TK = _pick_kv_tile(T)

    per_layer = lambda b, l: (l, 0, 0)          # weights indexed by layer axis
    in_specs = [
        pl.BlockSpec((1, T, E), lambda b, l: (b, 0, 0)),   # x (fetched once / batch)
        pl.BlockSpec((T, T), lambda b, l: (0, 0)),         # causal additive bias
        pl.BlockSpec((1, E), lambda b, l: (0, 0)),         # final LN gamma
        pl.BlockSpec((1, E), lambda b, l: (0, 0)),         # final LN beta
        pl.BlockSpec((1, 1, E), per_layer),                # ln1_g
        pl.BlockSpec((1, 1, E), per_layer),                # ln1_b
        pl.BlockSpec((1, E, 3 * E), per_layer),            # w_qkv (bf16)
        pl.BlockSpec((1, 1, 3 * E), per_layer),            # b_qkv
        pl.BlockSpec((1, E, E), per_layer),                # w_o   (bf16)
        pl.BlockSpec((1, 1, E), per_layer),                # b_o
        pl.BlockSpec((1, 1, E), per_layer),                # ln2_g
        pl.BlockSpec((1, 1, E), per_layer),                # ln2_b
        pl.BlockSpec((1, E, F), per_layer),                # w1    (bf16)
        pl.BlockSpec((1, 1, F), per_layer),                # b1
        pl.BlockSpec((1, F, E), per_layer),                # w2    (bf16)
        pl.BlockSpec((1, 1, E), per_layer),                # b2
    ]
    # TODO(synk): for large E on v7x (64 MiB VMEM), add a K/N-tiling grid axis
    # (or pltpu.emit_pipeline) so w_qkv/w_o/w1/w2 stream as tiles instead of
    # whole-layer blocks.
    return pl.pallas_call(
        partial(gpt_stack_kernel, H, TK),
        out_shape=jax.ShapeDtypeStruct((B, 1, E), jnp.float32),
        grid=(B, L),                       # batch outer (parallel), layer inner
        in_specs=in_specs,
        out_specs=pl.BlockSpec((1, 1, E), lambda b, l: (b, 0, 0)),
        scratch_shapes=[pltpu.VMEM((T, E), jnp.float32)],   # residual carry
        compiler_params=pltpu.CompilerParams(
            dimension_semantics=("parallel", "arbitrary"),
            vmem_limit_bytes=vmem_limit),
    )(x, bias, lnf_g, lnf_b,
      stk["ln1_g"], stk["ln1_b"], stk["w_qkv"], stk["b_qkv"],
      stk["w_o"], stk["b_o"], stk["ln2_g"], stk["ln2_b"],
      stk["w1"], stk["b1"], stk["w2"], stk["b2"])


def run_lm_head(x_norm, w_head_p, b_head_p, vocab_size, vmem_limit):
    """x_norm: (B, E) f32 pre-normalized; w_head_p: (E, Vp) bf16, Vp % TN == 0."""
    B, E = x_norm.shape
    Vp = w_head_p.shape[-1]
    TN = _pick_vocab_tile(Vp)

    logits_p = pl.pallas_call(
        lm_head_kernel,
        out_shape=jax.ShapeDtypeStruct((B, Vp), jnp.float32),
        grid=(Vp // TN,),
        in_specs=[
            pl.BlockSpec((B, E), lambda j: (0, 0)),
            pl.BlockSpec((E, TN), lambda j: (0, j)),   # stream vocab tiles
            pl.BlockSpec((1, TN), lambda j: (0, j)),
        ],
        out_specs=pl.BlockSpec((B, TN), lambda j: (0, j)),
        compiler_params=pltpu.CompilerParams(
            dimension_semantics=("parallel",),
            vmem_limit_bytes=vmem_limit),
    )(x_norm, w_head_p, b_head_p)
    return logits_p[:, :vocab_size]


def gpt_forward(tokens, params, cfg):
    """Matches GPTModel.forward(X, targets=None) -> (logits[B,1,V], None)."""
    B, T = tokens.shape
    E, H = cfg["embed_dim"], cfg["num_heads"]
    assert T <= cfg["context_length"]
    assert T % 8 == 0, "sequence length must be a multiple of 8 (sublane tile)"

    vlim = _vmem_limit_bytes()

    # embedding gather + positional encoding (glue; dropout p=0 -> identity)
    emb = jnp.take(params["tok_emb"], tokens, axis=0)              # (B, T, E)
    x = (emb + params["pos_emb"][:, :T, :]).astype(jnp.float32)

    # precomputed additive causal bias (0 / -1e30), resident once in VMEM
    rows = jax.lax.broadcasted_iota(jnp.int32, (T, T), 0)
    cols = jax.lax.broadcasted_iota(jnp.int32, (T, T), 1)
    bias = jnp.where(cols <= rows, 0.0, -1e30).astype(jnp.float32)

    y = run_blocks(x, bias, params["stack"], params["lnf_g"], params["lnf_b"],
                   H, vlim)                                        # (B, 1, E)
    x_last = y.reshape(B, E)                                       # already LN'ed
    logits = run_lm_head(x_last, params["w_head"], params["b_head"],
                         cfg["vocab_size"], vlim)                  # (B, V)
    return logits[:, None, :], None
    # TODO(synk): targets/cross-entropy path, nonzero dropout, and multinomial
    # generate() are host-side conveniences and are not implemented as kernels.


# ---------------------------------------------------------------------------
# pure-JAX reference (mirrors the torch module in f32) for correctness check
# ---------------------------------------------------------------------------
def gpt_forward_ref(tokens, params, cfg):
    B, T = tokens.shape
    E, H = cfg["embed_dim"], cfg["num_heads"]
    D = E // H
    V = cfg["vocab_size"]
    stk = params["stack"]
    L = stk["w_qkv"].shape[0]

    def ln(v, g, b):
        mu = v.mean(-1, keepdims=True)
        var = ((v - mu) ** 2).mean(-1, keepdims=True)
        return (v - mu) / jnp.sqrt(var + EPS) * g + b

    x = (jnp.take(params["tok_emb"], tokens, axis=0)
         + params["pos_emb"][:, :T, :]).astype(jnp.float32)
    mask = jnp.tril(jnp.ones((T, T), dtype=bool))
    for l in range(L):
        xn = ln(x, stk["ln1_g"][l, 0], stk["ln1_b"][l, 0])
        qkv = xn @ stk["w_qkv"][l].astype(jnp.float32) + stk["b_qkv"][l, 0]
        q, k, v = jnp.split(qkv, 3, axis=-1)
        q = q.reshape(B, T, H, D).transpose(0, 2, 1, 3)
        k = k.reshape(B, T, H, D).transpose(0, 2, 1, 3)
        v = v.reshape(B, T, H, D).transpose(0, 2, 1, 3)
        s = (q @ jnp.swapaxes(k, -1, -2)) / math.sqrt(D)
        s = jnp.where(mask, s, -jnp.inf)
        p = jax.nn.softmax(s, axis=-1)
        o = (p @ v).transpose(0, 2, 1, 3).reshape(B, T, E)
        x = x + o @ stk["w_o"][l].astype(jnp.float32) + stk["b_o"][l, 0]
        xn2 = ln(x, stk["ln2_g"][l, 0], stk["ln2_b"][l, 0])
        h1 = xn2 @ stk["w1"][l].astype(jnp.float32) + stk["b1"][l, 0]
        h1 = _gelu_exact(h1)
        x = x + h1 @ stk["w2"][l].astype(jnp.float32) + stk["b2"][l, 0]
    xf = ln(x[:, -1, :], params["lnf_g"][0], params["lnf_b"][0])
    logits = (xf @ params["w_head"].astype(jnp.float32)[:, :V]
              + params["b_head"][0, :V])
    return logits[:, None, :], None


# ---------------------------------------------------------------------------
# deterministic parameter init (synthetic; shapes follow the torch module)
# weights used on the MXU are stored bf16; biases / LN params / embeddings f32
# ---------------------------------------------------------------------------
def init_params(key, cfg):
    E, V, C = cfg["embed_dim"], cfg["vocab_size"], cfg["context_length"]
    L, F = cfg["num_blocks"], 4 * cfg["embed_dim"]

    def nrm(k, shape, scale=0.02):
        return scale * jax.random.normal(k, shape, jnp.float32)

    keys = jax.random.split(key, 8)
    Vp = _pad_vocab(V)                          # lane-dense lm_head tiles
    w_head = nrm(keys[1], (E, V))
    w_head_p = jnp.zeros((E, Vp), jnp.float32).at[:, :V].set(w_head).astype(jnp.bfloat16)

    wq, wk, wv = nrm(keys[2], (L, E, E)), nrm(keys[3], (L, E, E)), nrm(keys[4], (L, E, E))

    params = {
        "tok_emb": nrm(keys[0], (V, E)),
        "pos_emb": jnp.zeros((1, C, E), jnp.float32),    # torch init: zeros
        "lnf_g": jnp.ones((1, E), jnp.float32),
        "lnf_b": jnp.zeros((1, E), jnp.float32),
        "w_head": w_head_p,                              # (E, Vp) bf16
        "b_head": jnp.zeros((1, Vp), jnp.float32),
        "stack": {                                       # per-layer weights, stacked on L
            "ln1_g": jnp.ones((L, 1, E), jnp.float32),
            "ln1_b": jnp.zeros((L, 1, E), jnp.float32),
            "w_qkv": jnp.concatenate([wq, wk, wv], axis=-1).astype(jnp.bfloat16),  # (L,E,3E)
            "b_qkv": jnp.zeros((L, 1, 3 * E), jnp.float32),
            "w_o": nrm(keys[5], (L, E, E)).astype(jnp.bfloat16),
            "b_o": jnp.zeros((L, 1, E), jnp.float32),
            "ln2_g": jnp.ones((L, 1, E), jnp.float32),
            "ln2_b": jnp.zeros((L, 1, E), jnp.float32),
            "w1": nrm(keys[6], (L, E, F)).astype(jnp.bfloat16),
            "b1": jnp.zeros((L, 1, F), jnp.float32),
            "w2": nrm(keys[7], (L, F, E)).astype(jnp.bfloat16),
            "b2": jnp.zeros((L, 1, E), jnp.float32),
        },
    }
    return params


if __name__ == "__main__":
    cfg = dict(vocab_size=128, embed_dim=32, num_heads=4,
               context_length=8, num_blocks=2, dropout=0.0)

    key = jax.random.PRNGKey(0)
    pkey, xkey = jax.random.split(key)
    params = init_params(pkey, cfg)

    batch, seq = 2, 8
    tokens = jax.random.randint(xkey, (batch, seq), 0, cfg["vocab_size"], dtype=jnp.int32)

    logits, loss = gpt_forward(tokens, params, cfg)
    logits = jax.block_until_ready(logits)

    assert logits.shape == (batch, 1, cfg["vocab_size"])
    assert loss is None
    assert bool(jnp.all(jnp.isfinite(logits)))

    # correctness vs. pure-JAX f32 reference (bf16 matmul weights + approx
    # reciprocal give ~1e-3-level deviations; tolerance covers them)
    ref_logits, _ = gpt_forward_ref(tokens, params, cfg)
    err = float(jnp.max(jnp.abs(logits - ref_logits)))
    assert err < 2e-2, f"mismatch vs reference: max abs err = {err}"

    print("KERNEL_OK")
</pallas_src>

<mosaic_0001>
module attributes {stable_mosaic.version = 11 : i64} {
  func.func @gpt_stack_kernel(%arg0: i32, %arg1: i32, %arg2: memref<1x8x32xf32, #tpu.memory_space<vmem>>, %arg3: memref<8x8xf32, #tpu.memory_space<vmem>>, %arg4: memref<1x32xf32, #tpu.memory_space<vmem>>, %arg5: memref<1x32xf32, #tpu.memory_space<vmem>>, %arg6: memref<1x1x32xf32, #tpu.memory_space<vmem>>, %arg7: memref<1x1x32xf32, #tpu.memory_space<vmem>>, %arg8: memref<1x32x96xbf16, #tpu.memory_space<vmem>>, %arg9: memref<1x1x96xf32, #tpu.memory_space<vmem>>, %arg10: memref<1x32x32xbf16, #tpu.memory_space<vmem>>, %arg11: memref<1x1x32xf32, #tpu.memory_space<vmem>>, %arg12: memref<1x1x32xf32, #tpu.memory_space<vmem>>, %arg13: memref<1x1x32xf32, #tpu.memory_space<vmem>>, %arg14: memref<1x32x128xbf16, #tpu.memory_space<vmem>>, %arg15: memref<1x1x128xf32, #tpu.memory_space<vmem>>, %arg16: memref<1x128x32xbf16, #tpu.memory_space<vmem>>, %arg17: memref<1x1x32xf32, #tpu.memory_space<vmem>>, %arg18: memref<1x1x32xf32, #tpu.memory_space<vmem>>, %arg19: memref<8x32xf32, #tpu.memory_space<vmem>>) attributes {dimension_semantics = [#tpu.dimension_semantics<parallel>, #tpu.dimension_semantics<arbitrary>], iteration_bounds = array<i64: 2, 2>, scalar_prefetch = 0 : i64, scratch_operands = 1 : i64, tpu.core_type = #tpu.core_type<tc>, window_params = [{transform_indices = @transform_0, window_bounds = array<i64: 1, 8, 32>}, {pipeline_mode = #tpu.pipeline_mode<synchronous>, transform_indices = @transform_1, window_bounds = array<i64: 8, 8>}, {pipeline_mode = #tpu.pipeline_mode<synchronous>, transform_indices = @transform_2, window_bounds = array<i64: 1, 32>}, {pipeline_mode = #tpu.pipeline_mode<synchronous>, transform_indices = @transform_3, window_bounds = array<i64: 1, 32>}, {transform_indices = @transform_4, window_bounds = array<i64: 1, 1, 32>}, {transform_indices = @transform_5, window_bounds = array<i64: 1, 1, 32>}, {transform_indices = @transform_6, window_bounds = array<i64: 1, 32, 96>}, {transform_indices = @transform_7, window_bounds = array<i64: 1, 1, 96>}, {transform_indices = @transform_8, window_bounds = array<i64: 1, 32, 32>}, {transform_indices = @transform_9, window_bounds = array<i64: 1, 1, 32>}, {transform_indices = @transform_10, window_bounds = array<i64: 1, 1, 32>}, {transform_indices = @transform_11, window_bounds = array<i64: 1, 1, 32>}, {transform_indices = @transform_12, window_bounds = array<i64: 1, 32, 128>}, {transform_indices = @transform_13, window_bounds = array<i64: 1, 1, 128>}, {transform_indices = @transform_14, window_bounds = array<i64: 1, 128, 32>}, {transform_indices = @transform_15, window_bounds = array<i64: 1, 1, 32>}, {transform_indices = @transform_16, window_bounds = array<i64: 1, 1, 32>}]} {
    %c0_i32 = arith.constant 0 : i32
    %0 = arith.cmpi eq, %arg1, %c0_i32 : i32
    %1 = arith.extui %0 : i1 to i32
    %c0_i32_0 = arith.constant 0 : i32
    %2 = arith.cmpi ne, %1, %c0_i32_0 : i32
    scf.if %2 {
      %c0_67 = arith.constant 0 : index
      %c0_68 = arith.constant 0 : index
      %c0_69 = arith.constant 0 : index
      %174 = vector.load %arg2[%c0_67, %c0_68, %c0_69] : memref<1x8x32xf32, #tpu.memory_space<vmem>>, vector<1x8x32xf32>
      %175 = vector.shape_cast %174 : vector<1x8x32xf32> to vector<8x32xf32>
      %c0_70 = arith.constant 0 : index
      %c0_71 = arith.constant 0 : index
      %176 = vector.load %arg19[%c0_70, %c0_71] : memref<8x32xf32, #tpu.memory_space<vmem>>, vector<8x32xf32>
      tpu.vector_store %arg19[%c0_70, %c0_71], %175 {strides = array<i32>} : memref<8x32xf32, #tpu.memory_space<vmem>>, vector<8x32xf32>,
    } else {
    }
    %c0 = arith.constant 0 : index
    %c0_1 = arith.constant 0 : index
    %3 = vector.load %arg19[%c0, %c0_1] : memref<8x32xf32, #tpu.memory_space<vmem>>, vector<8x32xf32>
    %c0_2 = arith.constant 0 : index
    %c0_3 = arith.constant 0 : index
    %c0_4 = arith.constant 0 : index
    %4 = vector.load %arg6[%c0_2, %c0_3, %c0_4] : memref<1x1x32xf32, #tpu.memory_space<vmem>>, vector<1x1x32xf32>
    %5 = vector.shape_cast %4 : vector<1x1x32xf32> to vector<1x32xf32>
    %c0_5 = arith.constant 0 : index
    %c0_6 = arith.constant 0 : index
    %c0_7 = arith.constant 0 : index
    %6 = vector.load %arg7[%c0_5, %c0_6, %c0_7] : memref<1x1x32xf32, #tpu.memory_space<vmem>>, vector<1x1x32xf32>
    %7 = vector.shape_cast %6 : vector<1x1x32xf32> to vector<1x32xf32>
    %cst = arith.constant dense<0.000000e+00> : vector<8xf32>
    %8 = vector.multi_reduction <add>, %3, %cst [1] : vector<8x32xf32> to vector<8xf32>
    %9 = vector.shape_cast %8 : vector<8xf32> to vector<8x1xf32>
    %cst_8 = arith.constant 3.200000e+01 : f32
    %10 = vector.broadcast %cst_8 : f32 to vector<8x1xf32>
    %11 = arith.divf %9, %10 : vector<8x1xf32>
    %12 = vector.broadcast %11 : vector<8x1xf32> to vector<8x32xf32>
    %13 = arith.subf %3, %12 : vector<8x32xf32>
    %14 = arith.mulf %13, %13 : vector<8x32xf32>
    %cst_9 = arith.constant dense<0.000000e+00> : vector<8xf32>
    %15 = vector.multi_reduction <add>, %14, %cst_9 [1] : vector<8x32xf32> to vector<8xf32>
    %16 = vector.shape_cast %15 : vector<8xf32> to vector<8x1xf32>
    %cst_10 = arith.constant 3.200000e+01 : f32
    %17 = vector.broadcast %cst_10 : f32 to vector<8x1xf32>
    %18 = arith.divf %16, %17 : vector<8x1xf32>
    %19 = vector.broadcast %11 : vector<8x1xf32> to vector<8x32xf32>
    %20 = arith.subf %3, %19 : vector<8x32xf32>
    %cst_11 = arith.constant 9.99999974E-6 : f32
    %21 = vector.broadcast %cst_11 : f32 to vector<8x1xf32>
    %22 = arith.addf %18, %21 : vector<8x1xf32>
    %23 = math.rsqrt %22 : vector<8x1xf32>
    %24 = vector.broadcast %23 : vector<8x1xf32> to vector<8x32xf32>
    %25 = arith.mulf %20, %24 : vector<8x32xf32>
    %26 = vector.broadcast %5 : vector<1x32xf32> to vector<8x32xf32>
    %27 = arith.mulf %25, %26 : vector<8x32xf32>
    %28 = vector.broadcast %7 : vector<1x32xf32> to vector<8x32xf32>
    %29 = arith.addf %27, %28 : vector<8x32xf32>
    %30 = arith.truncf %29 : vector<8x32xf32> to vector<8x32xbf16>
    %c0_12 = arith.constant 0 : index
    %c0_13 = arith.constant 0 : index
    %c0_14 = arith.constant 0 : index
    %31 = vector.load %arg8[%c0_12, %c0_13, %c0_14] : memref<1x32x96xbf16, #tpu.memory_space<vmem>>, vector<1x32x96xbf16>
    %32 = vector.shape_cast %31 : vector<1x32x96xbf16> to vector<32x96xbf16>
    %cst_15 = arith.constant dense<0.000000e+00> : vector<8x96xf32>
    %33 = tpu.matmul %30, %32, %cst_15 {dimension_numbers = #tpu.dot_dimension_numbers<[1], [0], [0], [1], [0, 0, 1, 1], [], []>} : vector<8x32xbf16>, vector<32x96xbf16>, vector<8x96xf32> -> vector<8x96xf32>
    %c0_16 = arith.constant 0 : index
    %c0_17 = arith.constant 0 : index
    %c0_18 = arith.constant 0 : index
    %34 = vector.load %arg9[%c0_16, %c0_17, %c0_18] : memref<1x1x96xf32, #tpu.memory_space<vmem>>, vector<1x1x96xf32>
    %35 = vector.shape_cast %34 : vector<1x1x96xf32> to vector<1x96xf32>
    %36 = vector.broadcast %35 : vector<1x96xf32> to vector<8x96xf32>
    %37 = arith.addf %33, %36 : vector<8x96xf32>
    %38 = vector.extract_strided_slice %37 {offsets = [0, 0], sizes = [8, 32], strides = [1, 1]} : vector<8x96xf32> to vector<8x32xf32>
    %cst_19 = arith.constant 0.353553385 : f32
    %39 = vector.broadcast %cst_19 : f32 to vector<8x32xf32>
    %40 = arith.mulf %38, %39 : vector<8x32xf32>
    %41 = vector.extract_strided_slice %37 {offsets = [0, 32], sizes = [8, 32], strides = [1, 1]} : vector<8x96xf32> to vector<8x32xf32>
    %42 = vector.extract_strided_slice %37 {offsets = [0, 64], sizes = [8, 32], strides = [1, 1]} : vector<8x96xf32> to vector<8x32xf32>
    %43 = vector.extract_strided_slice %40 {offsets = [0, 0], sizes = [8, 8], strides = [1, 1]} : vector<8x32xf32> to vector<8x8xf32>
    %44 = vector.extract_strided_slice %40 {offsets = [0, 8], sizes = [8, 8], strides = [1, 1]} : vector<8x32xf32> to vector<8x8xf32>
    %45 = vector.extract_strided_slice %40 {offsets = [0, 16], sizes = [8, 8], strides = [1, 1]} : vector<8x32xf32> to vector<8x8xf32>
    %46 = vector.extract_strided_slice %40 {offsets = [0, 24], sizes = [8, 8], strides = [1, 1]} : vector<8x32xf32> to vector<8x8xf32>
    %47 = vector.shape_cast %43 : vector<8x8xf32> to vector<1x8x8xf32>
    %48 = vector.shape_cast %44 : vector<8x8xf32> to vector<1x8x8xf32>
    %49 = vector.shape_cast %45 : vector<8x8xf32> to vector<1x8x8xf32>
    %50 = vector.shape_cast %46 : vector<8x8xf32> to vector<1x8x8xf32>
    %51 = tpu.concatenate %47, %48, %49, %50 in 0 : vector<1x8x8xf32>, vector<1x8x8xf32>, vector<1x8x8xf32>, vector<1x8x8xf32> -> vector<4x8x8xf32>
    %52 = arith.truncf %51 : vector<4x8x8xf32> to vector<4x8x8xbf16>
    %53 = vector.extract_strided_slice %41 {offsets = [0, 0], sizes = [8, 8], strides = [1, 1]} : vector<8x32xf32> to vector<8x8xf32>
    %54 = vector.extract_strided_slice %41 {offsets = [0, 8], sizes = [8, 8], strides = [1, 1]} : vector<8x32xf32> to vector<8x8xf32>
    %55 = vector.extract_strided_slice %41 {offsets = [0, 16], sizes = [8, 8], strides = [1, 1]} : vector<8x32xf32> to vector<8x8xf32>
    %56 = vector.extract_strided_slice %41 {offsets = [0, 24], sizes = [8, 8], strides = [1, 1]} : vector<8x32xf32> to vector<8x8xf32>
    %57 = vector.shape_cast %53 : vector<8x8xf32> to vector<1x8x8xf32>
    %58 = vector.shape_cast %54 : vector<8x8xf32> to vector<1x8x8xf32>
    %59 = vector.shape_cast %55 : vector<8x8xf32> to vector<1x8x8xf32>
    %60 = vector.shape_cast %56 : vector<8x8xf32> to vector<1x8x8xf32>
    %61 = tpu.concatenate %57, %58, %59, %60 in 0 : vector<1x8x8xf32>, vector<1x8x8xf32>, vector<1x8x8xf32>, vector<1x8x8xf32> -> vector<4x8x8xf32>
    %62 = arith.truncf %61 : vector<4x8x8xf32> to vector<4x8x8xbf16>
    %63 = vector.extract_strided_slice %42 {offsets = [0, 0], sizes = [8, 8], strides = [1, 1]} : vector<8x32xf32> to vector<8x8xf32>
    %64 = vector.extract_strided_slice %42 {offsets = [0, 8], sizes = [8, 8], strides = [1, 1]} : vector<8x32xf32> to vector<8x8xf32>
    %65 = vector.extract_strided_slice %42 {offsets = [0, 16], sizes = [8, 8], strides = [1, 1]} : vector<8x32xf32> to vector<8x8xf32>
    %66 = vector.extract_strided_slice %42 {offsets = [0, 24], sizes = [8, 8], strides = [1, 1]} : vector<8x32xf32> to vector<8x8xf32>
    %67 = vector.shape_cast %63 : vector<8x8xf32> to vector<1x8x8xf32>
    %68 = vector.shape_cast %64 : vector<8x8xf32> to vector<1x8x8xf32>
    %69 = vector.shape_cast %65 : vector<8x8xf32> to vector<1x8x8xf32>
    %70 = vector.shape_cast %66 : vector<8x8xf32> to vector<1x8x8xf32>
    %71 = tpu.concatenate %67, %68, %69, %70 in 0 : vector<1x8x8xf32>, vector<1x8x8xf32>, vector<1x8x8xf32>, vector<1x8x8xf32> -> vector<4x8x8xf32>
    %72 = arith.truncf %71 : vector<4x8x8xf32> to vector<4x8x8xbf16>
    %cst_20 = arith.constant 0xFF800000 : f32
    %73 = vector.broadcast %cst_20 : f32 to vector<4x8x1xf32>
    %cst_21 = arith.constant 0.000000e+00 : f32
    %74 = vector.broadcast %cst_21 : f32 to vector<4x8x1xf32>
    %cst_22 = arith.constant 0.000000e+00 : f32
    %75 = vector.broadcast %cst_22 : f32 to vector<4x8x8xf32>
    %c0_23 = arith.constant 0 : index
    %c0_24 = arith.constant 0 : index
    %76 = vector.load %arg3[%c0_23, %c0_24] : memref<8x8xf32, #tpu.memory_space<vmem>>, vector<8x8xf32>
    "tpu.trace_start"() <{level = 10 : i32, message = "hqd,hkd->hqk"}> : () -> ()
    %cst_25 = arith.constant dense<0.000000e+00> : vector<4x8x8xf32>
    %77 = tpu.matmul %52, %62, %cst_25 {dimension_numbers = #tpu.dot_dimension_numbers<[2], [2], [1], [1], [0, 0, 0, 1, 1, 1], [0], [0]>} : vector<4x8x8xbf16>, vector<4x8x8xbf16>, vector<4x8x8xf32> -> vector<4x8x8xf32>
    "tpu.trace_stop"() : () -> ()
    %78 = vector.shape_cast %76 : vector<8x8xf32> to vector<1x8x8xf32>
    %79 = vector.broadcast %78 : vector<1x8x8xf32> to vector<4x8x8xf32>
    %80 = arith.addf %77, %79 : vector<4x8x8xf32>
    %cst_26 = arith.constant dense<0xFF800000> : vector<4x8xf32>
    %81 = vector.multi_reduction <maximumf>, %80, %cst_26 [2] : vector<4x8x8xf32> to vector<4x8xf32>
    %82 = vector.shape_cast %81 : vector<4x8xf32> to vector<4x8x1xf32>
    %83 = arith.maximumf %73, %82 : vector<4x8x1xf32>
    %84 = arith.subf %73, %83 : vector<4x8x1xf32>
    %85 = math.exp %84 : vector<4x8x1xf32>
    %86 = vector.broadcast %83 : vector<4x8x1xf32> to vector<4x8x8xf32>
    %87 = arith.subf %80, %86 : vector<4x8x8xf32>
    %88 = math.exp %87 : vector<4x8x8xf32>
    %89 = arith.mulf %85, %74 : vector<4x8x1xf32>
    %cst_27 = arith.constant dense<0.000000e+00> : vector<4x8xf32>
    %90 = vector.multi_reduction <add>, %88, %cst_27 [2] : vector<4x8x8xf32> to vector<4x8xf32>
    %91 = vector.shape_cast %90 : vector<4x8xf32> to vector<4x8x1xf32>
    %92 = arith.addf %89, %91 : vector<4x8x1xf32>
    %93 = vector.broadcast %85 : vector<4x8x1xf32> to vector<4x8x8xf32>
    %94 = arith.mulf %93, %75 : vector<4x8x8xf32>
    %95 = arith.truncf %88 : vector<4x8x8xf32> to vector<4x8x8xbf16>
    "tpu.trace_start"() <{level = 10 : i32, message = "hqk,hkd->hqd"}> : () -> ()
    %cst_28 = arith.constant dense<0.000000e+00> : vector<4x8x8xf32>
    %96 = tpu.matmul %95, %72, %cst_28 {dimension_numbers = #tpu.dot_dimension_numbers<[2], [1], [1], [2], [0, 0, 0, 1, 1, 2], [0], [0]>} : vector<4x8x8xbf16>, vector<4x8x8xbf16>, vector<4x8x8xf32> -> vector<4x8x8xf32>
    "tpu.trace_stop"() : () -> ()
    %97 = arith.addf %94, %96 : vector<4x8x8xf32>
    %98 = tpu.reciprocal %92 {approx = true} : vector<4x8x1xf32> -> vector<4x8x1xf32>
    %99 = vector.broadcast %98 : vector<4x8x1xf32> to vector<4x8x8xf32>
    %100 = arith.mulf %97, %99 : vector<4x8x8xf32>
    %101 = vector.extract_strided_slice %100 {offsets = [0, 0, 0], sizes = [1, 8, 8], strides = [1, 1, 1]} : vector<4x8x8xf32> to vector<1x8x8xf32>
    %102 = vector.shape_cast %101 : vector<1x8x8xf32> to vector<8x8xf32>
    %103 = vector.extract_strided_slice %100 {offsets = [1, 0, 0], sizes = [1, 8, 8], strides = [1, 1, 1]} : vector<4x8x8xf32> to vector<1x8x8xf32>
    %104 = vector.shape_cast %103 : vector<1x8x8xf32> to vector<8x8xf32>
    %105 = vector.extract_strided_slice %100 {offsets = [2, 0, 0], sizes = [1, 8, 8], strides = [1, 1, 1]} : vector<4x8x8xf32> to vector<1x8x8xf32>
    %106 = vector.shape_cast %105 : vector<1x8x8xf32> to vector<8x8xf32>
    %107 = vector.extract_strided_slice %100 {offsets = [3, 0, 0], sizes = [1, 8, 8], strides = [1, 1, 1]} : vector<4x8x8xf32> to vector<1x8x8xf32>
    %108 = vector.shape_cast %107 : vector<1x8x8xf32> to vector<8x8xf32>
    %109 = tpu.concatenate %102, %104, %106, %108 in 1 : vector<8x8xf32>, vector<8x8xf32>, vector<8x8xf32>, vector<8x8xf32> -> vector<8x32xf32>
    %110 = arith.truncf %109 : vector<8x32xf32> to vector<8x32xbf16>
    %c0_29 = arith.constant 0 : index
    %c0_30 = arith.constant 0 : index
    %c0_31 = arith.constant 0 : index
    %111 = vector.load %arg10[%c0_29, %c0_30, %c0_31] : memref<1x32x32xbf16, #tpu.memory_space<vmem>>, vector<1x32x32xbf16>
    %112 = vector.shape_cast %111 : vector<1x32x32xbf16> to vector<32x32xbf16>
    %cst_32 = arith.constant dense<0.000000e+00> : vector<8x32xf32>
    %113 = tpu.matmul %110, %112, %cst_32 {dimension_numbers = #tpu.dot_dimension_numbers<[1], [0], [0], [1], [0, 0, 1, 1], [], []>} : vector<8x32xbf16>, vector<32x32xbf16>, vector<8x32xf32> -> vector<8x32xf32>
    %c0_33 = arith.constant 0 : index
    %c0_34 = arith.constant 0 : index
    %c0_35 = arith.constant 0 : index
    %114 = vector.load %arg11[%c0_33, %c0_34, %c0_35] : memref<1x1x32xf32, #tpu.memory_space<vmem>>, vector<1x1x32xf32>
    %115 = vector.shape_cast %114 : vector<1x1x32xf32> to vector<1x32xf32>
    %116 = vector.broadcast %115 : vector<1x32xf32> to vector<8x32xf32>
    %117 = arith.addf %113, %116 : vector<8x32xf32>
    %118 = arith.addf %3, %117 : vector<8x32xf32>
    %c0_36 = arith.constant 0 : index
    %c0_37 = arith.constant 0 : index
    %c0_38 = arith.constant 0 : index
    %119 = vector.load %arg12[%c0_36, %c0_37, %c0_38] : memref<1x1x32xf32, #tpu.memory_space<vmem>>, vector<1x1x32xf32>
    %120 = vector.shape_cast %119 : vector<1x1x32xf32> to vector<1x32xf32>
    %c0_39 = arith.constant 0 : index
    %c0_40 = arith.constant 0 : index
    %c0_41 = arith.constant 0 : index
    %121 = vector.load %arg13[%c0_39, %c0_40, %c0_41] : memref<1x1x32xf32, #tpu.memory_space<vmem>>, vector<1x1x32xf32>
    %122 = vector.shape_cast %121 : vector<1x1x32xf32> to vector<1x32xf32>
    %cst_42 = arith.constant dense<0.000000e+00> : vector<8xf32>
    %123 = vector.multi_reduction <add>, %118, %cst_42 [1] : vector<8x32xf32> to vector<8xf32>
    %124 = vector.shape_cast %123 : vector<8xf32> to vector<8x1xf32>
    %cst_43 = arith.constant 3.200000e+01 : f32
    %125 = vector.broadcast %cst_43 : f32 to vector<8x1xf32>
    %126 = arith.divf %124, %125 : vector<8x1xf32>
    %127 = vector.broadcast %126 : vector<8x1xf32> to vector<8x32xf32>
    %128 = arith.subf %118, %127 : vector<8x32xf32>
    %129 = arith.mulf %128, %128 : vector<8x32xf32>
    %cst_44 = arith.constant dense<0.000000e+00> : vector<8xf32>
    %130 = vector.multi_reduction <add>, %129, %cst_44 [1] : vector<8x32xf32> to vector<8xf32>
    %131 = vector.shape_cast %130 : vector<8xf32> to vector<8x1xf32>
    %cst_45 = arith.constant 3.200000e+01 : f32
    %132 = vector.broadcast %cst_45 : f32 to vector<8x1xf32>
    %133 = arith.divf %131, %132 : vector<8x1xf32>
    %134 = vector.broadcast %126 : vector<8x1xf32> to vector<8x32xf32>
    %135 = arith.subf %118, %134 : vector<8x32xf32>
    %cst_46 = arith.constant 9.99999974E-6 : f32
    %136 = vector.broadcast %cst_46 : f32 to vector<8x1xf32>
    %137 = arith.addf %133, %136 : vector<8x1xf32>
    %138 = math.rsqrt %137 : vector<8x1xf32>
    %139 = vector.broadcast %138 : vector<8x1xf32> to vector<8x32xf32>
    %140 = arith.mulf %135, %139 : vector<8x32xf32>
    %141 = vector.broadcast %120 : vector<1x32xf32> to vector<8x32xf32>
    %142 = arith.mulf %140, %141 : vector<8x32xf32>
    %143 = vector.broadcast %122 : vector<1x32xf32> to vector<8x32xf32>
    %144 = arith.addf %142, %143 : vector<8x32xf32>
    %145 = arith.truncf %144 : vector<8x32xf32> to vector<8x32xbf16>
    %c0_47 = arith.constant 0 : index
    %c0_48 = arith.constant 0 : index
    %c0_49 = arith.constant 0 : index
    %146 = vector.load %arg14[%c0_47, %c0_48, %c0_49] : memref<1x32x128xbf16, #tpu.memory_space<vmem>>, vector<1x32x128xbf16>
    %147 = vector.shape_cast %146 : vector<1x32x128xbf16> to vector<32x128xbf16>
    %cst_50 = arith.constant dense<0.000000e+00> : vector<8x128xf32>
    %148 = tpu.matmul %145, %147, %cst_50 {dimension_numbers = #tpu.dot_dimension_numbers<[1], [0], [0], [1], [0, 0, 1, 1], [], []>} : vector<8x32xbf16>, vector<32x128xbf16>, vector<8x128xf32> -> vector<8x128xf32>
    %c0_51 = arith.constant 0 : index
    %c0_52 = arith.constant 0 : index
    %c0_53 = arith.constant 0 : index
    %149 = vector.load %arg15[%c0_51, %c0_52, %c0_53] : memref<1x1x128xf32, #tpu.memory_space<vmem>>, vector<1x1x128xf32>
    %150 = vector.shape_cast %149 : vector<1x1x128xf32> to vector<1x128xf32>
    %151 = vector.broadcast %150 : vector<1x128xf32> to vector<8x128xf32>
    %152 = arith.addf %148, %151 : vector<8x128xf32>
    %cst_54 = arith.constant 5.000000e-01 : f32
    %153 = vector.broadcast %cst_54 : f32 to vector<8x128xf32>
    %154 = arith.mulf %153, %152 : vector<8x128xf32>
    %cst_55 = arith.constant 0.707106769 : f32
    %155 = vector.broadcast %cst_55 : f32 to vector<8x128xf32>
    %156 = arith.mulf %152, %155 : vector<8x128xf32>
    %157 = math.erf %156 : vector<8x128xf32>
    %cst_56 = arith.constant 1.000000e+00 : f32
    %158 = vector.broadcast %cst_56 : f32 to vector<8x128xf32>
    %159 = arith.addf %158, %157 : vector<8x128xf32>
    %160 = arith.mulf %154, %159 : vector<8x128xf32>
    %161 = arith.truncf %160 : vector<8x128xf32> to vector<8x128xbf16>
    %c0_57 = arith.constant 0 : index
    %c0_58 = arith.constant 0 : index
    %c0_59 = arith.constant 0 : index
    %162 = vector.load %arg16[%c0_57, %c0_58, %c0_59] : memref<1x128x32xbf16, #tpu.memory_space<vmem>>, vector<1x128x32xbf16>
    %163 = vector.shape_cast %162 : vector<1x128x32xbf16> to vector<128x32xbf16>
    %cst_60 = arith.constant dense<0.000000e+00> : vector<8x32xf32>
    %164 = tpu.matmul %161, %163, %cst_60 {dimension_numbers = #tpu.dot_dimension_numbers<[1], [0], [0], [1], [0, 0, 1, 1], [], []>} : vector<8x128xbf16>, vector<128x32xbf16>, vector<8x32xf32> -> vector<8x32xf32>
    %c0_61 = arith.constant 0 : index
    %c0_62 = arith.constant 0 : index
    %c0_63 = arith.constant 0 : index
    %165 = vector.load %arg17[%c0_61, %c0_62, %c0_63] : memref<1x1x32xf32, #tpu.memory_space<vmem>>, vector<1x1x32xf32>
    %166 = vector.shape_cast %165 : vector<1x1x32xf32> to vector<1x32xf32>
    %167 = vector.broadcast %166 : vector<1x32xf32> to vector<8x32xf32>
    %168 = arith.addf %164, %167 : vector<8x32xf32>
    %169 = arith.addf %118, %168 : vector<8x32xf32>
    %c0_64 = arith.constant 0 : index
    %c0_65 = arith.constant 0 : index
    %170 = vector.load %arg19[%c0_64, %c0_65] : memref<8x32xf32, #tpu.memory_space<vmem>>, vector<8x32xf32>
    tpu.vector_store %arg19[%c0_64, %c0_65], %169 {strides = array<i32>} : memref<8x32xf32, #tpu.memory_space<vmem>>, vector<8x32xf32>,
    %c1_i32 = arith.constant 1 : i32
    %171 = arith.cmpi eq, %arg1, %c1_i32 : i32
    %172 = arith.extui %171 : i1 to i32
    %c0_i32_66 = arith.constant 0 : i32
    %173 = arith.cmpi ne, %172, %c0_i32_66 : i32
    scf.if %173 {
      %174 = vector.extract_strided_slice %169 {offsets = [7, 0], sizes = [1, 32], strides = [1, 1]} : vector<8x32xf32> to vector<1x32xf32>
      %c0_67 = arith.constant 0 : index
      %c0_68 = arith.constant 0 : index
      %175 = vector.load %arg4[%c0_67, %c0_68] : memref<1x32xf32, #tpu.memory_space<vmem>>, vector<1x32xf32>
      %c0_69 = arith.constant 0 : index
      %c0_70 = arith.constant 0 : index
      %176 = vector.load %arg5[%c0_69, %c0_70] : memref<1x32xf32, #tpu.memory_space<vmem>>, vector<1x32xf32>
      %cst_71 = arith.constant dense<0.000000e+00> : vector<1xf32>
      %177 = vector.multi_reduction <add>, %174, %cst_71 [1] : vector<1x32xf32> to vector<1xf32>
      %178 = vector.shape_cast %177 : vector<1xf32> to vector<1x1xf32>
      %cst_72 = arith.constant 3.200000e+01 : f32
      %179 = vector.broadcast %cst_72 : f32 to vector<1x1xf32>
      %180 = arith.divf %178, %179 : vector<1x1xf32>
      %181 = vector.broadcast %180 : vector<1x1xf32> to vector<1x32xf32>
      %182 = arith.subf %174, %181 : vector<1x32xf32>
      %183 = arith.mulf %182, %182 : vector<1x32xf32>
      %cst_73 = arith.constant dense<0.000000e+00> : vector<1xf32>
      %184 = vector.multi_reduction <add>, %183, %cst_73 [1] : vector<1x32xf32> to vector<1xf32>
      %185 = vector.shape_cast %184 : vector<1xf32> to vector<1x1xf32>
      %cst_74 = arith.constant 3.200000e+01 : f32
      %186 = vector.broadcast %cst_74 : f32 to vector<1x1xf32>
      %187 = arith.divf %185, %186 : vector<1x1xf32>
      %188 = vector.broadcast %180 : vector<1x1xf32> to vector<1x32xf32>
      %189 = arith.subf %174, %188 : vector<1x32xf32>
      %cst_75 = arith.constant 9.99999974E-6 : f32
      %190 = vector.broadcast %cst_75 : f32 to vector<1x1xf32>
      %191 = arith.addf %187, %190 : vector<1x1xf32>
      %192 = math.rsqrt %191 : vector<1x1xf32>
      %193 = vector.broadcast %192 : vector<1x1xf32> to vector<1x32xf32>
      %194 = arith.mulf %189, %193 : vector<1x32xf32>
      %195 = arith.mulf %194, %175 : vector<1x32xf32>
      %196 = arith.addf %195, %176 : vector<1x32xf32>
      %c0_76 = arith.constant 0 : index
      %c0_77 = arith.constant 0 : index
      %c0_78 = arith.constant 0 : index
      %197 = vector.load %arg18[%c0_76, %c0_77, %c0_78] : memref<1x1x32xf32, #tpu.memory_space<vmem>>, vector<1x1x32xf32>
      %198 = vector.shape_cast %197 : vector<1x1x32xf32> to vector<1x32xf32>
      %199 = vector.shape_cast %196 : vector<1x32xf32> to vector<1x1x32xf32>
      tpu.vector_store %arg18[%c0_76, %c0_77, %c0_78], %199 {strides = array<i32>} : memref<1x1x32xf32, #tpu.memory_space<vmem>>, vector<1x1x32xf32>,
    } else {
    }
    return
  }
  func.func @transform_0(%arg0: i32, %arg1: i32) -> (i32, i32, i32) {
    %c0_i32 = arith.constant 0 : i32
    %c0_i32_0 = arith.constant 0 : i32
    %c0_i32_1 = arith.constant 0 : i32
    return %arg0, %c0_i32, %c0_i32_0 : i32, i32, i32
  }
  func.func @transform_1(%arg0: i32, %arg1: i32) -> (i32, i32) {
    %c0_i32 = arith.constant 0 : i32
    %c0_i32_0 = arith.constant 0 : i32
    %c0_i32_1 = arith.constant 0 : i32
    return %c0_i32, %c0_i32_0 : i32, i32
  }
  func.func @transform_2(%arg0: i32, %arg1: i32) -> (i32, i32) {
    %c0_i32 = arith.constant 0 : i32
    %c0_i32_0 = arith.constant 0 : i32
    %c0_i32_1 = arith.constant 0 : i32
    return %c0_i32, %c0_i32_0 : i32, i32
  }
  func.func @transform_3(%arg0: i32, %arg1: i32) -> (i32, i32) {
    %c0_i32 = arith.constant 0 : i32
    %c0_i32_0 = arith.constant 0 : i32
    %c0_i32_1 = arith.constant 0 : i32
    return %c0_i32, %c0_i32_0 : i32, i32
  }
  func.func @transform_4(%arg0: i32, %arg1: i32) -> (i32, i32, i32) {
    %c0_i32 = arith.constant 0 : i32
    %c0_i32_0 = arith.constant 0 : i32
    %c0_i32_1 = arith.constant 0 : i32
    return %arg1, %c0_i32, %c0_i32_0 : i32, i32, i32
  }
  func.func @transform_5(%arg0: i32, %arg1: i32) -> (i32, i32, i32) {
    %c0_i32 = arith.constant 0 : i32
    %c0_i32_0 = arith.constant 0 : i32
    %c0_i32_1 = arith.constant 0 : i32
    return %arg1, %c0_i32, %c0_i32_0 : i32, i32, i32
  }
  func.func @transform_6(%arg0: i32, %arg1: i32) -> (i32, i32, i32) {
    %c0_i32 = arith.constant 0 : i32
    %c0_i32_0 = arith.constant 0 : i32
    %c0_i32_1 = arith.constant 0 : i32
    return %arg1, %c0_i32, %c0_i32_0 : i32, i32, i32
  }
  func.func @transform_7(%arg0: i32, %arg1: i32) -> (i32, i32, i32) {
    %c0_i32 = arith.constant 0 : i32
    %c0_i32_0 = arith.constant 0 : i32
    %c0_i32_1 = arith.constant 0 : i32
    return %arg1, %c0_i32, %c0_i32_0 : i32, i32, i32
  }
  func.func @transform_8(%arg0: i32, %arg1: i32) -> (i32, i32, i32) {
    %c0_i32 = arith.constant 0 : i32
    %c0_i32_0 = arith.constant 0 : i32
    %c0_i32_1 = arith.constant 0 : i32
    return %arg1, %c0_i32, %c0_i32_0 : i32, i32, i32
  }
  func.func @transform_9(%arg0: i32, %arg1: i32) -> (i32, i32, i32) {
    %c0_i32 = arith.constant 0 : i32
    %c0_i32_0 = arith.constant 0 : i32
    %c0_i32_1 = arith.constant 0 : i32
    return %arg1, %c0_i32, %c0_i32_0 : i32, i32, i32
  }
  func.func @transform_10(%arg0: i32, %arg1: i32) -> (i32, i32, i32) {
    %c0_i32 = arith.constant 0 : i32
    %c0_i32_0 = arith.constant 0 : i32
    %c0_i32_1 = arith.constant 0 : i32
    return %arg1, %c0_i32, %c0_i32_0 : i32, i32, i32
  }
  func.func @transform_11(%arg0: i32, %arg1: i32) -> (i32, i32, i32) {
    %c0_i32 = arith.constant 0 : i32
    %c0_i32_0 = arith.constant 0 : i32
    %c0_i32_1 = arith.constant 0 : i32
    return %arg1, %c0_i32, %c0_i32_0 : i32, i32, i32
  }
  func.func @transform_12(%arg0: i32, %arg1: i32) -> (i32, i32, i32) {
    %c0_i32 = arith.constant 0 : i32
    %c0_i32_0 = arith.constant 0 : i32
    %c0_i32_1 = arith.constant 0 : i32
    return %arg1, %c0_i32, %c0_i32_0 : i32, i32, i32
  }
  func.func @transform_13(%arg0: i32, %arg1: i32) -> (i32, i32, i32) {
    %c0_i32 = arith.constant 0 : i32
    %c0_i32_0 = arith.constant 0 : i32
    %c0_i32_1 = arith.constant 0 : i32
    return %arg1, %c0_i32, %c0_i32_0 : i32, i32, i32
  }
  func.func @transform_14(%arg0: i32, %arg1: i32) -> (i32, i32, i32) {
    %c0_i32 = arith.constant 0 : i32
    %c0_i32_0 = arith.constant 0 : i32
    %c0_i32_1 = arith.constant 0 : i32
    return %arg1, %c0_i32, %c0_i32_0 : i32, i32, i32
  }
  func.func @transform_15(%arg0: i32, %arg1: i32) -> (i32, i32, i32) {
    %c0_i32 = arith.constant 0 : i32
    %c0_i32_0 = arith.constant 0 : i32
    %c0_i32_1 = arith.constant 0 : i32
    return %arg1, %c0_i32, %c0_i32_0 : i32, i32, i32
  }
  func.func @transform_16(%arg0: i32, %arg1: i32) -> (i32, i32, i32) {
    %c0_i32 = arith.constant 0 : i32
    %c0_i32_0 = arith.constant 0 : i32
    %c0_i32_1 = arith.constant 0 : i32
    return %arg0, %c0_i32, %c0_i32_0 : i32, i32, i32
  }
}

</mosaic_0001>

<bundles_post_ra>
// kernel: tpu_custom_call.1
= control target key start
LH: loop header
LB: loop body
LE: loop exit
PB: predicated region body
PF: predicated region fallthrough
CT: control target
= control target key end

     0   :  { %s2724_s0 = inlined_call_operand.vmem [shape: f32[2,8,32], index: 0, kind: input, shape index: {}]   ;;  %s2725_s1 = inlined_call_operand.vmem [shape: f32[8,8], index: 1, kind: input, shape index: {}]   ;;  %s2726_s2 = inlined_call_operand.vmem [shape: f32[1,32], index: 2, kind: input, shape index: {}]   ;;  %s2727_s3 = inlined_call_operand.vmem [shape: f32[1,32], index: 3, kind: input, shape index: {}]   ;;  %s2728_s4 = inlined_call_operand.vmem [shape: f32[2,1,32], index: 4, kind: input, shape index: {}]   ;;  %s2729_s5 = inlined_call_operand.vmem [shape: f32[2,1,32], index: 5, kind: input, shape index: {}]   ;;  %s2730_s6 = inlined_call_operand.vmem [shape: bf16[2,32,96], index: 6, kind: input, shape index: {}]   ;;  %s2731_s7 = inlined_call_operand.vmem [shape: f32[2,1,96], index: 7, kind: input, shape index: {}]   ;;  %s2732_s8 = inlined_call_operand.vmem [shape: bf16[2,32,32], index: 8, kind: input, shape index: {}]   ;;  %s2733_s9 = inlined_call_operand.vmem [shape: f32[2,1,32], index: 9, kind: input, shape index: {}]   ;;  %s2734_s10 = inlined_call_operand.vmem [shape: f32[2,1,32], index: 10, kind: input, shape index: {}]   ;;  %s2735_s11 = inlined_call_operand.vmem [shape: f32[2,1,32], index: 11, kind: input, shape index: {}]   ;;  %s2736_s12 = inlined_call_operand.vmem [shape: bf16[2,32,128], index: 12, kind: input, shape index: {}]   ;;  %s2737_s13 = inlined_call_operand.vmem [shape: f32[2,1,128], index: 13, kind: input, shape index: {}]   ;;  %s2738_s14 = inlined_call_operand.vmem [shape: bf16[2,128,32], index: 14, kind: input, shape index: {}]   ;;  %s2739_s15 = inlined_call_operand.vmem [shape: f32[2,1,32], index: 15, kind: input, shape index: {}]   ;;  %s2740_s16 = inlined_call_operand.hbm [shape: f32[2,1,32], index: 16, kind: output, shape index: {}]  }
   0x1   :  { %2754 = sst [smem:[#allocation18_spill]] %s2724_s0 }
   0x2   :  { %2755 = sst [smem:[#allocation19_spill]] %s2725_s1 }
   0x3   :  { %2756 = sst [smem:[#allocation20_spill]] %s2726_s2 }
   0x4   :  { %2757 = sst [smem:[#allocation21_spill]] %s2727_s3 }
   0x5   :  { %2758 = sst [smem:[#allocation22_spill]] %s2729_s5 }
   0x6   :  { %2759 = sst [smem:[#allocation23_spill]] %s2730_s6 }
   0x7   :  { %2760 = sst [smem:[#allocation24_spill]] %s2732_s8 }
   0x8   :  { %2761 = sst [smem:[#allocation25_spill]] %s2740_s16 }
   0x9   :  { %21 = vsyncpa [#allocation4], 0 }
   0xa   :  { %23 = vsyncpa [#allocation4 + $0x1], 0  ;;  %s2356_s21 = smov 0   ;;  %s2358_s22 = smov 0  }
   0xb   :  { %s2360_s23 = smov 0   ;;  %s2362_s24 = smov 0  }
   0xc   :  { %s2364_s25 = smov 0   ;;  %s2366_s26 = smov 0  }
   0xd   :  { %s2368_s27 = smov 0   ;;  %s2370_s28 = smov 0  }
   0xe LB: > { %2762 = sst [smem:[#allocation6_spill]] %s2230_s21  ;;  %s1853_s29 = sadd.s32 4294967295, %s2258_s28   ;;  %s2258_s28 = sphi %s2370_s28, %s29_s28   ;;  %s2254_s27 = sphi %s2368_s27, %s2805_s27   ;;  %s2250_s26 = sphi %s2366_s26, %s2804_s26   ;;  %s2246_s25 = sphi %s2364_s25, %s2803_s25   ;;  %s2242_s24 = sphi %s2362_s24, %s2802_s24   ;;  %s2238_s23 = sphi %s2360_s23, %s2801_s23   ;;  %s2234_s22 = sphi %s2358_s22, %s2807_s22   ;;  %s2230_s21 = sphi %s2356_s21, %s2806_s21  }
   0xf   : > { %2763 = sst [smem:[#allocation7_spill]] %s2238_s23  ;;  %s1854_s30 = sadd.s32 4294967294, %s2258_s28  }
  0x10   : > { %2764 = sst [smem:[#allocation8_spill]] %s2242_s24  ;;  %s38_s0 = sadd.s32 1, %s2250_s26 }
  0x11   : > { %2765 = sst [smem:[#allocation9_spill]] %s2246_s25  ;;  %p39_p0 = scmp.ge.s32.totalorder %s38_s0, 2 }
  0x12   : > { %2766 = sst [smem:[#allocation10_spill]] %s2250_s26  ;;  %s41_s17 = sadd.s32 1, %s2254_s27 }
  0x13   : > { %2767 = sst [smem:[#allocation11_spill]] %s2254_s27  ;;  %p459_p1 = scmp.ne.s32.totalorder %s2238_s23, %s2234_s22 }
  0x14   : > { %2768 = sst [smem:[#allocation12_spill]] %s2258_s28  ;;  %p460_p2 = scmp.eq.s32.totalorder %s1853_s29, 3 }
  0x15   : > { %s2809_s0 = smov (%p39_p0, %s38_s0), 0  ;;  %s2811_s17 = smov (!%p39_p0, %s41_s17), %s2254_s27 }
  0x16   : > { %2769 = sst [smem:[#allocation13_spill]] %s2809_s0  ;;  %p2405_p3 = por %p460_p2, %p459_p1 }
  0x17   : > { %p465_p4 = scmp.ne.s32.totalorder %s2234_s22, %s2230_s21  ;;  %p43_p5 = scmp.ge.s32.totalorder %s2811_s17, 2 }
  0x18   : > { %s2770_s18 = scalar_select %p2405_p3, 1, 0 }
  0x19   : > { %p466_p6 = scmp.eq.s32.totalorder %s1854_s30, 3  ;;  %p1857_p7 = scmp.ge.s32.totalorder %s2258_s28, 1 }
  0x1a   : > { %2771 = sst [smem:[#allocation14_spill]] %s2770_s18  ;;  %p580_p8 = scmp.lt.s32.totalorder %s2258_s28, 5 }
  0x1b   : > { %s2813_s17 = smov (%p43_p5, %s2811_s17), 0  ;;  %p2415_p9 = por %p466_p6, %p465_p4 }
  0x1c   : > { %2772 = sst [smem:[#allocation15_spill]] %s2813_s17  ;;  %p581_p10 = pnand %p1857_p7, %p580_p8 }
  0x1d   : > { %s2773_s19 = scalar_select %p2415_p9, 1, 0 }
  0x1e   : > { %s446_s20 = ssub.s32 %s2254_s27, %s2813_s17  ;;  %s449_s29 = sadd.s32 1, %s2238_s23 }
  0x1f   : > { %2774 = sst [smem:[#allocation16_spill]] %s2773_s19  ;;  %p447_p11 = scmp.eq.s32.totalorder %s446_s20, 0 }
  0x20   : > { %584 = sbr.rel (%p581_p10) target bundleno = 2865 (0xb31), region = 84  ;;  %p672_p12 = scmp.lt.s32.totalorder (!%p581_p10), %s2246_s25, 1 }
  0x21   : > { %s2423_s0 = scalar_select %p447_p11, %s2238_s23, %s449_s29  }
  0x22   : > { %p676_p13 = scmp.lt.s32.totalorder (!%p581_p10), %s2242_s24, 1  ;;  %s2776_s27 = sld [smem:[#allocation18_spill]] (!%p581_p10) }
  0x23   : > { %2775 = sst [smem:[#allocation17_spill]] %s2423_s0  ;;  %s2779_s8 = sld [smem:[#allocation24_spill]] (!%p581_p10) }
  0x24   : > { %s2778_s6 = sld [smem:[#allocation23_spill]] (!%p581_p10)  ;;  %s2780_s2 = sand.u32 (!%p581_p10), 1, %s2234_s22  }
  0x25   : > { %s2491_s3 = scalar_lea.vmem (!%p581_p10), [#allocation3], %s2780_s2  ;;  %s2781_s5 = sld [smem:[#allocation8_spill]] (!%p581_p10) }
  0x27   : > { %s673_s26 = scalar_select %p672_p12, %s2246_s25, 1 }
  0x28   : > { %s2430_s21 = scalar_select %p676_p13, %s2242_s24, 1 }
  0x29   : > { %s1858_s20 = sshll.u32 %s673_s26, 3 }
  0x2a   : > { %s675_s30 = scalar_lea.vmem %s2776_s27, %s1858_s20  ;;  %s1907_s25 = sshll.u32 %s2430_s21, 4 }
  0x2b   : > { %s2447_s1 = scalar_lea.vmem %s2778_s6, %s1907_s25  ;;  %s2456_s20 = scalar_lea.vmem %s2779_s8, %s1907_s25 }
  0x2c   : > { %s703_s6 = scalar_lea.vmem %s2735_s11, %s2430_s21  ;;  %s2473_s26 = scalar_lea.vmem %s2736_s12, %s1907_s25 }
  0x2d   : > { %s711_s17 = scalar_lea.vmem %s2737_s13, %s2430_s21  ;;  %s1910_s8 = sshll.u32 %s2430_s21, 6 }
  0x2e   : > { %s719_s16 = scalar_lea.vmem %s2739_s15, %s2430_s21  ;;  %s2487_s19 = scalar_lea.vmem %s2738_s14, %s1910_s8 }
  0x2f   : > { %p1867_p0 = scmp.ne.s32.totalorder %s2781_s5, 0 }
  0x30   : > { %v725_v0 = vld [vmem:[%s675_s30] sm:$0xff] (!%p1867_p0)  ;;  %vm726_vm0 = vcmask (!%p1867_p0), 261120  }
  0x31   : > { %724 = sbr.rel (%p1867_p0) target bundleno = 56 (0x38), region = 88  ;;  %727 = vst.msk [vmem:[#allocation2] sm:$0xff] (!%p1867_p0), %vm726_vm0, %v725_v0 }
  0x38 PF: > { %v2494_v1 = vld [vmem:[#allocation2] sm:$0xff]  ;;  %vm731_vm1 = vcmask 261120   ;;  %v2260_v9 = vmov 0.0   ;;  %vm2261_vm2 = vmmov 0   ;;  %v2119_v10 = vld [vmem:[%s2447_s1 + $0x8] sm:$0xff]   ;;  %s2783_s29 = sld [smem:[#allocation22_spill]]  ;;  %s2785_s18 = scalar_lea.vmem %s2731_s7, %s2430_s21 }
  0x39   : > { %v732_v2 = vsel %vm731_vm1, %v2494_v1, 0.0  ;;  %v2118_v8 = vld [vmem:[%s2447_s1] sm:$0xff]   ;;  %1945 = vmatprep.subr.bf16.mxu0 %v2260_v9  ;;  %1949 = vmatprep.mubr.msk.bf16.mxu0 %vm2261_vm2, %v2260_v9  ;;  %s2782_s1 = scalar_lea.vmem %s2728_s4, %s2430_s21  ;;  %s2262_s28 = smov 104   ;;  %vm860_vm3 = vcmask 64512   ;;  %vm1119_vm4 = vcmask 1043456   ;;  %vm1332_vm5 = vcmask 130048  }
  0x3a   : > { %733 = vadd.xlane.f32.xlu0 %v732_v2  ;;  %1946 = vmatpush3.bf16.msra.mxu0 %v2118_v8  ;;  %v1868_v15 = vld [vmem:[%s2782_s1] ss:$0 sm:$0xff]  ;;  %s2263_s2 = smov 120   ;;  %s2264_s5 = smov 112   ;;  %vm1334_vm6 = vcmask 195584  }
  0x3b   : > { %1965 = vmatprep.subr.bf16.mxu1 %v2260_v9  ;;  %1947 = vmatprep.subr.bf16.mxu0 %v2260_v9  ;;  %v1870_v21 = vld [vmem:[%s2785_s18] ss:$0 sm:$0xff]  ;;  %s2265_s8 = smov 96   ;;  %s2266_s25 = smov 64  }
  0x3c   : > { %1967 = vmatprep.mubr.msk.bf16.mxu1 %vm2261_vm2, %v2260_v9  ;;  %s2786_s24 = sld [smem:[#allocation19_spill]]  ;;  %s2787_s18 = scalar_lea.vmem %s2733_s9, %s2430_s21 }
  0x3e   : > { %1948 = vmatpush3.bf16.msra.mxu0 %v2119_v10  ;;  %s2784_s27 = scalar_lea.vmem %s2783_s29, %s2430_s21  ;;  %s2267_s29 = smov 8  }
  0x3f   : > { %1953 = vmatprep.subr.bf16.mxu0 %v2260_v9  ;;  %v1869_v17 = vld [vmem:[%s2784_s27] ss:$0 sm:$0xff]  ;;  %s2269_s27 = smov 24  }
  0x42   : > { %v856_v54 = vld [vmem:[%s2786_s24] sm:$0xff] }
  0xc7   : > { %v734_v3 = vpop.xlane.xlu0 %733 }
  0xc8   : > { %v736_v4 = vmul.f32 0.03125, %v734_v3 }
  0xca   : > { %v737_v5 = vsub.f32 %v2494_v1, %v736_v4 }
  0xcc   : > { %v738_v6 = vmul.f32 %v737_v5, %v737_v5 }
  0xce   : > { %v739_v7 = vsel %vm731_vm1, %v738_v6, 0.0 }
  0xcf   : > { %740 = vadd.xlane.f32.xlu0 %v739_v7 }
 0x15c   : > { %v741_v11 = vpop.xlane.xlu0 %740 }
 0x15d   : > { %v742_v12 = vmul.f32 0.03125, %v741_v11 }
 0x15f   : > { %v743_v13 = vadd.f32 1e-05, %v742_v12 }
 0x161   : > { %2132 = vrsqrt.f32 %v743_v13 }
 0x16b   : > { %v2133_v14 = vpop.eup %2132 }
 0x16c   : > { %v745_v16 = vmul.f32 %v2133_v14, %v737_v5 }
 0x16e   : > { %v752_v18 = vmul.f32 %v1868_v15, %v745_v16 }
 0x170   : > { %v759_v19 = vadd.f32 %v1869_v17, %v752_v18 }
 0x172   : > { %v760_v20 = vpack.c.bf16 %v759_v19, %v759_v19 }
 0x174   : > { %1950 = vmatmul.mubr.msk.bf16.vlgmr.msra.gmra.mrb[0].mxu0 %vm731_vm1, %v760_v20 }
 0x175   : > { %1955 = vmatprep.mubr.msk.bf16.mxu0 %vm2261_vm2, %v2260_v9 }
 0x247   : > { %v821_v22 = vpop.f32.mrb[0].mxu0 }
 0x248   : > { %v822_v23 = vadd.f32 %v1870_v21, %v821_v22  ;;  %v1951_v24 = vpop.f32.mrb[1].mxu0 }
 0x249   : > { %v824_v25 = vpop.f32.mrb[2].mxu0 }
 0x24a   : > { %849 = vrot.lane.b32.xlu0 %v822_v23, %s2262_s28  ;;  %843 = vrot.lane.b32.xlu1 %v822_v23, %s2263_s2  ;;  %v1952_v26 = vpop.f32.mrb[3].mxu0  ;;  %v827_v27 = vmul.f32 0.35355338, %v822_v23  ;;  %v852_v28 = vpack.c.bf16 %v822_v23, %v822_v23 }
 0x24c   : > { %v838_v37 = vpack.c.bf16 %v827_v27, %v827_v27 }
 0x24e   : > { %846 = vrot.lane.b32.xlu1 %v822_v23, %s2264_s5  ;;  %835 = vrot.lane.b32.xlu0 %v827_v27, %s2262_s28 }
 0x252   : > { %858 = vrot.lane.b32.xlu1 %v852_v28, %s2265_s8  ;;  %1114 = vrot.lane.b32.xlu0 %v852_v28, %s2266_s25 }
 0x256   : > { %829 = vrot.lane.b32.xlu1 %v827_v27, %s2263_s2  ;;  %s2788_s2 = scalar_lea.vmem %s2734_s10, %s2430_s21 }
 0x2bc   : > { %v844_v29 = vpop.permute.xlu1 %843  ;;  %v850_v33 = vpop.permute.xlu0 %849 }
 0x2bd   : > { %v853_v30 = vpack.c.bf16 %v844_v29, %v844_v29  ;;  %v2532_v35 = vpack.c.bf16 %v850_v33, %v850_v33 }
 0x2bf   : > { %908 = vrot.lane.b32.xlu1 %v853_v30, %s2265_s8 }
 0x2c0   : > { %v847_v31 = vpop.permute.xlu1 %846  ;;  %v836_v43 = vpop.permute.xlu0 %835 }
 0x2c1   : > { %v2529_v32 = vpack.c.bf16 %v847_v31, %v847_v31  ;;  %v841_v50 = vpack.c.bf16 %v836_v43, %v836_v43 }
 0x2c3   : > { %957 = vrot.lane.b32.xlu1 %v2529_v32, %s2265_s8 }
 0x2c4   : > { %v859_v34 = vpop.permute.xlu1 %858  ;;  %v1115_v47 = vpop.permute.xlu0 %1114 }
 0x2c5   : > { %v865_v36 = vsel %vm860_vm3, %v859_v34, 0  ;;  %v1121_v51 = vsel %vm1119_vm4, %v1115_v47, 0 }
 0x2c6   : > { %1954 = vmatpush3.bf16.xpose.msra.mxu0 %v865_v36 }
 0x2c7   : > { %1006 = vrot.lane.b32.xlu1 %v2532_v35, %s2265_s8  ;;  %1959 = vmatprep.subr.bf16.mxu0 %v2260_v9 }
 0x2c8   : > { %v830_v38 = vpop.permute.xlu1 %829 }
 0x2c9   : > { %v839_v44 = vpack.c.bf16 %v830_v38, %v830_v38 }
 0x2cb   : > { %832 = vrot.lane.b32.xlu1 %v827_v27, %s2264_s5 }
 0x2cd   : > { %1956 = vmatmul.mubr.msk.bf16.vlgmr.msra.gmra.mrb[4].mxu0 %vm860_vm3, %v838_v37 }
 0x2ce   : > { %1961 = vmatprep.mubr.msk.bf16.mxu0 %vm2261_vm2, %v2260_v9 }
 0x2cf   : > { %1163 = vrot.lane.b32.xlu1 %v853_v30, %s2266_s25 }
 0x331   : > { %v909_v39 = vpop.permute.xlu1 %908 }
 0x332   : > { %v914_v40 = vsel %vm860_vm3, %v909_v39, 0 }
 0x333   : > { %1960 = vmatpush3.bf16.xpose.msra.mxu0 %v914_v40 }
 0x334   : > { %1971 = vmatprep.subr.bf16.mxu0 %v2260_v9 }
 0x335   : > { %v958_v41 = vpop.permute.xlu1 %957 }
 0x336   : > { %v963_v42 = vsel %vm860_vm3, %v958_v41, 0 }
 0x337   : > { %1966 = vmatpush3.bf16.xpose.msra.mxu1 %v963_v42 }
 0x338   : > { %1977 = vmatprep.subr.bf16.mxu1 %v2260_v9 }
 0x339   : > { %v1007_v45 = vpop.permute.xlu1 %1006 }
 0x33a   : > { %v1012_v46 = vsel %vm860_vm3, %v1007_v45, 0  ;;  %1962 = vmatmul.mubr.msk.bf16.vlgmr.msra.gmra.mrb[8].mxu0 %vm860_vm3, %v839_v44 }
 0x33b   : > { %1972 = vmatpush3.bf16.xpose.msra.mxu0 %v1012_v46  ;;  %1973 = vmatprep.mubr.msk.bf16.mxu0 %vm2261_vm2, %v2260_v9 }
 0x33c   : > { %1983 = vmatprep.subr.bf16.mxu0 %v2260_v9 }
 0x33d   : > { %v833_v48 = vpop.permute.xlu1 %832 }
 0x33e   : > { %v840_v49 = vpack.c.bf16 %v833_v48, %v833_v48 }
 0x340   : > { %1968 = vmatmul.mubr.msk.bf16.vlgmr.msra.gmra.mrb[0].mxu1 %vm860_vm3, %v840_v49 }
 0x341   : > { %1978 = vmatpush3.bf16.msra.mxu1 %v1121_v51  ;;  %v1164_v52 = vpop.permute.xlu1 %1163  ;;  %1979 = vmatprep.mubr.msk.bf16.mxu1 %vm2261_vm2, %v2260_v9 }
 0x342   : > { %v1169_v53 = vsel %vm1119_vm4, %v1164_v52, 0  ;;  %1974 = vmatmul.mubr.msk.bf16.vlgmr.msra.gmra.mrb[12].mxu0 %vm860_vm3, %v841_v50  ;;  %1989 = vmatprep.subr.bf16.mxu1 %v2260_v9 }
 0x343   : > { %1984 = vmatpush3.bf16.msra.mxu0 %v1169_v53  ;;  %1985 = vmatprep.mubr.msk.bf16.mxu0 %vm2261_vm2, %v2260_v9 }
 0x344   : > { %1995 = vmatprep.subr.bf16.mxu0 %v2260_v9 }
 0x3a0   : > { %v901_v55 = vpop.f32.mrb[4].mxu0 }
 0x3a1   : > { %v902_v56 = vadd.f32 %v901_v55, %v856_v54  ;;  %v1957_v57 = vpop.f32.mrb[5].mxu0 }
 0x3a2   : > { %v904_v58 = vpop.f32.mrb[6].mxu0 }
 0x3a3   : > { %v1958_v59 = vpop.f32.mrb[7].mxu0  ;;  %v1054_v60 = vsel %vm860_vm3, %v902_v56, -inf }
 0x3a4   : > { %1055 = vmax.xlane.f32.xlu1 %v1054_v60 }
 0x40d   : > { %v950_v61 = vpop.f32.mrb[8].mxu0 }
 0x40e   : > { %v951_v62 = vadd.f32 %v950_v61, %v856_v54  ;;  %v1963_v63 = vpop.f32.mrb[9].mxu0 }
 0x40f   : > { %v953_v0 = vpop.f32.mrb[10].mxu0  ;;  %v2120_v63 = vld [vmem:[%s2456_s20] sm:$0xff]  }
 0x410   : > { %v1964_v2 = vpop.f32.mrb[11].mxu0  ;;  %v1057_v3 = vsel %vm860_vm3, %v951_v62, -inf }
 0x411   : > { %1058 = vmax.xlane.f32.xlu0 %v1057_v3 }
 0x413   : > { %v999_v4 = vpop.f32.mrb[0].mxu1 }
 0x414   : > { %v1000_v5 = vadd.f32 %v999_v4, %v856_v54  ;;  %v1969_v6 = vpop.f32.mrb[1].mxu1 }
 0x415   : > { %v1002_v7 = vpop.f32.mrb[2].mxu1  ;;  %v1048_v8 = vpop.f32.mrb[12].mxu0 }
 0x416   : > { %v1049_v10 = vadd.f32 %v1048_v8, %v856_v54  ;;  %v1970_v11 = vpop.f32.mrb[3].mxu1  ;;  %v1975_v12 = vpop.f32.mrb[13].mxu0  ;;  %v1060_v13 = vsel %vm860_vm3, %v1000_v5, -inf }
 0x417   : > { %1061 = vmax.xlane.f32.xlu0 %v1060_v13  ;;  %v1051_v14 = vpop.f32.mrb[14].mxu0 }
 0x418   : > { %v1976_v15 = vpop.f32.mrb[15].mxu0  ;;  %v1063_v16 = vsel %vm860_vm3, %v1049_v10, -inf }
 0x419   : > { %1064 = vmax.xlane.f32.xlu1 %v1063_v16 }
 0x42a   : > { %1211 = vrot.lane.b32.xlu1 %v2529_v32, %s2266_s25 }
 0x42d   : > { %1259 = vrot.lane.b32.xlu0 %v2532_v35, %s2266_s25 }
 0x431   : > { %v2571_v17 = vpop.xlane.xlu1 %1055 }
 0x432   : > { %v1078_v18 = vsub.f32 %v902_v56, %v2571_v17 }
 0x434   : > { %v1082_v19 = vmul.f32 1.442695, %v1078_v18 }
 0x436   : > { %2134 = vpow2.f32 %v1082_v19 }
 0x440   : > { %v2135_v20 = vpop.eup %2134 }
 0x441   : > { %v1110_v21 = vpack.c.bf16 %v2135_v20, %v2135_v20  ;;  %v1094_v38 = vsel %vm860_vm3, %v2135_v20, 0.0 }
 0x443   : > { %1980 = vmatmul.mubr.msk.bf16.vlgmr.msra.gmra.mrb[4].mxu1 %vm860_vm3, %v1110_v21 }
 0x444   : > { %1991 = vmatprep.mubr.msk.bf16.mxu1 %vm2261_vm2, %v2260_v9 }
 0x49e   : > { %v1059_v22 = vpop.xlane.xlu0 %1058 }
 0x49f   : > { %v1079_v23 = vsub.f32 %v951_v62, %v1059_v22  ;;  %v1067_v49 = vsub.f32 -inf, %v1059_v22 }
 0x4a1   : > { %v1084_v24 = vmul.f32 1.442695, %v1079_v23  ;;  %v1072_v50 = vmul.f32 1.442695, %v1067_v49 }
 0x4a3   : > { %2136 = vpow2.f32 %v1084_v24 }
 0x4a4   : > { %v1062_v25 = vpop.xlane.xlu0 %1061 }
 0x4a5   : > { %v1080_v26 = vsub.f32 %v1000_v5, %v1062_v25  ;;  %v1068_v51 = vsub.f32 -inf, %v1062_v25  ;;  %v2121_v5 = vld [vmem:[%s2456_s20 + $0x8] sm:$0xff]   ;;  %s2268_s20 = smov 16  }
 0x4a6   : > { %v1065_v27 = vpop.xlane.xlu1 %1064 }
 0x4a7   : > { %v1086_v28 = vmul.f32 1.442695, %v1080_v26  ;;  %v1081_v29 = vsub.f32 %v1049_v10, %v1065_v27  ;;  %v1069_v52 = vsub.f32 -inf, %v1065_v27  ;;  %v1074_v53 = vmul.f32 1.442695, %v1068_v51 }
 0x4a8   : > { %v1260_v34 = vpop.permute.xlu0 %1259 }
 0x4a9   : > { %v1088_v30 = vmul.f32 1.442695, %v1081_v29  ;;  %2138 = vpow2.f32 %v1086_v28  ;;  %v1265_v37 = vsel %vm1119_vm4, %v1260_v34, 0  ;;  %v1076_v54 = vmul.f32 1.442695, %v1069_v52 }
 0x4aa   : > { %v1212_v31 = vpop.permute.xlu1 %1211  ;;  %v1066_v29 = vsub.f32 -inf, %v2571_v17 }
 0x4ab   : > { %v1217_v32 = vsel %vm1119_vm4, %v1212_v31, 0  ;;  %2140 = vpow2.f32 %v1088_v30 }
 0x4ac   : > { %1990 = vmatpush3.bf16.msra.mxu1 %v1217_v32  ;;  %2142 = vpow2.f32 %v1072_v50  ;;  %v1070_v30 = vmul.f32 1.442695, %v1066_v29 }
 0x4ad   : > { %2001 = vmatprep.subr.bf16.mxu1 %v2260_v9  ;;  %v2137_v33 = vpop.eup %2136  ;;  %2144 = vpow2.f32 %v1074_v53 }
 0x4ae   : > { %v1097_v35 = vsel %vm860_vm3, %v2137_v33, 0.0  ;;  %v1111_v36 = vpack.c.bf16 %v2137_v33, %v2137_v33  ;;  %2146 = vpow2.f32 %v1076_v54 }
 0x4af   : > { %1098 = vadd.xlane.f32.xlu1 %v1097_v35 }
 0x4b0   : > { %1986 = vmatmul.mubr.msk.bf16.vlgmr.msra.gmra.mrb[16].mxu0 %vm860_vm3, %v1111_v36 }
 0x4b1   : > { %1996 = vmatpush3.bf16.msra.mxu0 %v1265_v37  ;;  %1997 = vmatprep.mubr.msk.bf16.mxu0 %vm2261_vm2, %v2260_v9 }
 0x4b2   : > { %2009 = vmatprep.subr.bf16.mxu0 %v2260_v9 }
 0x4b3   : > { %v2139_v39 = vpop.eup %2138  ;;  %1095 = vadd.xlane.f32.xlu1 %v1094_v38 }
 0x4b4   : > { %v1100_v40 = vsel %vm860_vm3, %v2139_v39, 0.0  ;;  %v1112_v41 = vpack.c.bf16 %v2139_v39, %v2139_v39 }
 0x4b5   : > { %v2141_v42 = vpop.eup %2140  ;;  %1101 = vadd.xlane.f32.xlu0 %v1100_v40 }
 0x4b6   : > { %1992 = vmatmul.mubr.msk.bf16.vlgmr.msra.gmra.mrb[8].mxu1 %vm860_vm3, %v1112_v41  ;;  %v1113_v43 = vpack.c.bf16 %v2141_v42, %v2141_v42  ;;  %v1103_v44 = vsel %vm860_vm3, %v2141_v42, 0.0  ;;  %v2143_v55 = vpop.eup %2142 }
 0x4b7   : > { %2005 = vmatprep.mubr.msk.bf16.mxu1 %vm2261_vm2, %v2260_v9  ;;  %v1091_v57 = vmul.f32 0.0, %v2143_v55  ;;  %v2145_v60 = vpop.eup %2144  ;;  %2002 = vmatpush3.bf16.msra.mxu1 %v2120_v63 }
 0x4b8   : > { %1998 = vmatmul.mubr.msk.bf16.vlgmr.msra.gmra.mrb[20].mxu0 %vm860_vm3, %v1113_v43  ;;  %v2147_v61 = vpop.eup %2146  ;;  %v1092_v62 = vmul.f32 0.0, %v2145_v60  ;;  %2003 = vmatprep.subr.bf16.mxu1 %v2260_v9  ;;  %v2126_v60 = vld [vmem:[%s2487_s19 + $0x10] sm:$0xff]  }
 0x4b9   : > { %1104 = vadd.xlane.f32.xlu0 %v1103_v44  ;;  %2013 = vmatprep.mubr.msk.bf16.mxu0 %vm2261_vm2, %v2260_v9  ;;  %v1093_v3 = vmul.f32 0.0, %v2147_v61  ;;  %v1882_v44 = vld [vmem:[%s2787_s18] ss:$0 sm:$0xff] }
 0x4bb   : > { %2004 = vmatpush3.bf16.msra.mxu1 %v2121_v5 }
 0x4bc   : > { %2017 = vmatprep.subr.bf16.mxu1 %v2260_v9 }
 0x516   : > { %v2594_v45 = vpop.f32.mrb[4].mxu1 }
 0x517   : > { %v1981_v46 = vpop.f32.mrb[5].mxu1 }
 0x518   : > { %v1160_v47 = vpop.f32.mrb[6].mxu1 }
 0x519   : > { %v1982_v48 = vpop.f32.mrb[7].mxu1 }
 0x53c   : > { %v1099_v56 = vpop.xlane.xlu1 %1098 }
 0x53d   : > { %v1107_v59 = vadd.f32 %v1099_v56, %v1091_v57 }
 0x53f   : > { %2148 = vrcp.f32 %v1107_v59  ;;  %v2125_v59 = vld [vmem:[%s2487_s19 + $0x8] sm:$0xff]  }
 0x540   : > { %v1096_v32 = vpop.xlane.xlu1 %1095 }
 0x542   : > { %v1102_v58 = vpop.xlane.xlu0 %1101 }
 0x543   : > { %v1108_v2 = vadd.f32 %v1102_v58, %v1092_v62  ;;  %v2123_v58 = vld [vmem:[%s2473_s26 + $0x8] sm:$0xff]  }
 0x545   : > { %2150 = vrcp.f32 %v1108_v2  ;;  %v1886_v2 = vld [vmem:[%s2788_s2] ss:$0 sm:$0xff] }
 0x546   : > { %v1105_v0 = vpop.xlane.xlu0 %1104 }
 0x547   : > { %v1109_v4 = vadd.f32 %v1105_v0, %v1093_v3 }
 0x549   : > { %2152 = vrcp.f32 %v1109_v4  ;;  %v2149_v10 = vpop.eup %2148  ;;  %v1887_v4 = vld [vmem:[%s703_s6] ss:$0 sm:$0xff] }
 0x54a   : > { %2154 = vpow2.f32 %v1070_v30 }
 0x54f   : > { %v2151_v18 = vpop.eup %2150 }
 0x553   : > { %v2153_v25 = vpop.eup %2152 }
 0x554   : > { %v2155_v31 = vpop.eup %2154 }
 0x555   : > { %v1090_v33 = vmul.f32 0.0, %v2155_v31 }
 0x557   : > { %v1106_v34 = vadd.f32 %v1096_v32, %v1090_v33  ;;  %v1307_v36 = vadd.f32 %v2594_v45, %v1090_v33 }
 0x559   : > { %2156 = vrcp.f32 %v1106_v34 }
 0x563   : > { %v2157_v35 = vpop.eup %2156 }
 0x564   : > { %v1315_v39 = vmul.f32 %v2157_v35, %v1307_v36 }
 0x583   : > { %v1205_v6 = vpop.f32.mrb[16].mxu0 }
 0x584   : > { %v1308_v7 = vadd.f32 %v1205_v6, %v1091_v57  ;;  %v1987_v8 = vpop.f32.mrb[17].mxu0  ;;  %v2122_v57 = vld [vmem:[%s2473_s26] sm:$0xff]  }
 0x585   : > { %v1208_v11 = vpop.f32.mrb[18].mxu0  ;;  %2010 = vmatpush3.bf16.msra.mxu0 %v2122_v57  ;;  %v2127_v8 = vld [vmem:[%s2487_s19 + $0x18] sm:$0xff]  }
 0x586   : > { %v1316_v12 = vmul.f32 %v2149_v10, %v1308_v7  ;;  %v1988_v13 = vpop.f32.mrb[19].mxu0  ;;  %2011 = vmatprep.subr.bf16.mxu0 %v2260_v9  ;;  %v2128_v10 = vld [vmem:[%s2487_s19 + $0x20] sm:$0xff]   ;;  %v2129_v11 = vld [vmem:[%s2487_s19 + $0x28] sm:$0xff]  }
 0x587   : > { %v2131_v13 = vld [vmem:[%s2487_s19 + $0x38] sm:$0xff]  }
 0x588   : > { %1320 = vrot.lane.b32.xlu0 %v1316_v12, %s2267_s29  ;;  %v2130_v12 = vld [vmem:[%s2487_s19 + $0x30] sm:$0xff]  }
 0x589   : > { %v1253_v14 = vpop.f32.mrb[8].mxu1  ;;  %2012 = vmatpush3.bf16.msra.mxu0 %v2123_v58 }
 0x58a   : > { %v1309_v15 = vadd.f32 %v1253_v14, %v1092_v62  ;;  %v1993_v16 = vpop.f32.mrb[9].mxu1  ;;  %v1888_v14 = vld [vmem:[%s711_s17] ss:$0 sm:$0xff]  ;;  %s2789_s17 = sld [smem:[#allocation8_spill]] }
 0x58b   : > { %v1256_v19 = vpop.f32.mrb[10].mxu1  ;;  %v1301_v20 = vpop.f32.mrb[20].mxu0 }
 0x58c   : > { %v1317_v21 = vmul.f32 %v2151_v18, %v1309_v15  ;;  %v1310_v22 = vadd.f32 %v1301_v20, %v1093_v3  ;;  %v1994_v23 = vpop.f32.mrb[11].mxu1  ;;  %v1999_v24 = vpop.f32.mrb[21].mxu0 }
 0x58d   : > { %v1304_v26 = vpop.f32.mrb[22].mxu0 }
 0x58e   : > { %v1318_v27 = vmul.f32 %v2153_v25, %v1310_v22  ;;  %1324 = vrot.lane.b32.xlu1 %v1317_v21, %s2268_s20  ;;  %v2000_v28 = vpop.f32.mrb[23].mxu0  ;;  %v1892_v26 = vld [vmem:[%s719_s16] ss:$0 sm:$0xff] }
 0x590   : > { %p1901_p1 = scmp.ne.s32.totalorder %s2789_s17, 1 }
 0x591   : > { %vm1625_vm7 = vcmask (!%p1901_p1), 261127   ;;  %s2790_s30 = sld [smem:[#allocation20_spill]] (!%p1901_p1)  ;;  %s2791_s20 = sld [smem:[#allocation21_spill]] (!%p1901_p1) }
 0x592   : > { %1328 = vrot.lane.b32.xlu1 %v1318_v27, %s2269_s27 }
 0x5fa   : > { %v1321_v37 = vpop.permute.xlu0 %1320 }
 0x5fb   : > { %v1331_v40 = vsel %vm860_vm3, %v1315_v39, %v1321_v37 }
 0x600   : > { %v1325_v38 = vpop.permute.xlu1 %1324 }
 0x601   : > { %v1333_v41 = vsel %vm1332_vm5, %v1331_v40, %v1325_v38 }
 0x604   : > { %v1329_v17 = vpop.permute.xlu1 %1328 }
 0x605   : > { %v1335_v42 = vsel %vm1334_vm6, %v1333_v41, %v1329_v17 }
 0x606   : > { %v1336_v43 = vpack.c.bf16 %v1335_v42, %v1335_v42  ;;  %v1902_v42 = vld [vmem:[%s2790_s30] ss:$0 sm:$0xff] (!%p1901_p1) }
 0x608   : > { %2006 = vmatmul.mubr.msk.bf16.vlgmr.msra.gmra.mrb[12].mxu1 %vm731_vm1, %v1336_v43 }
 0x609   : > { %2033 = vmatprep.mubr.msk.bf16.mxu1 %vm2261_vm2, %v2260_v9 }
 0x6db   : > { %v1397_v45 = vpop.f32.mrb[12].mxu1 }
 0x6dc   : > { %v1398_v46 = vadd.f32 %v1882_v44, %v1397_v45  ;;  %v2007_v47 = vpop.f32.mrb[13].mxu1  ;;  %v1903_v44 = vld [vmem:[%s2791_s20] ss:$0 sm:$0xff] (!%p1901_p1) }
 0x6dd   : > { %v1400_v48 = vpop.f32.mrb[14].mxu1 }
 0x6de   : > { %v2612_v49 = vadd.f32 %v1398_v46, %v2494_v1  ;;  %v2008_v50 = vpop.f32.mrb[15].mxu1  ;;  %v2124_v1 = vld [vmem:[%s2487_s19] sm:$0xff]  }
 0x6df   : > { %2018 = vmatpush3.bf16.msra.mxu1 %v2124_v1 }
 0x6e0   : > { %v1406_v51 = vsel %vm731_vm1, %v2612_v49, 0.0  ;;  %2019 = vmatprep.subr.bf16.mxu1 %v2260_v9 }
 0x6e1   : > { %1407 = vadd.xlane.f32.xlu0 %v1406_v51 }
 0x6e3   : > { %2020 = vmatpush3.bf16.msra.mxu1 %v2125_v59 }
 0x6e4   : > { %2021 = vmatprep.subr.bf16.mxu1 %v2260_v9 }
 0x6e7   : > { %2022 = vmatpush3.bf16.msra.mxu1 %v2126_v60 }
 0x6e8   : > { %2023 = vmatprep.subr.bf16.mxu1 %v2260_v9 }
 0x6eb   : > { %2024 = vmatpush3.bf16.msra.mxu1 %v2127_v8 }
 0x6ec   : > { %2025 = vmatprep.subr.bf16.mxu1 %v2260_v9 }
 0x6ef   : > { %2026 = vmatpush3.bf16.msra.mxu1 %v2128_v10 }
 0x6f0   : > { %2027 = vmatprep.subr.bf16.mxu1 %v2260_v9 }
 0x6f3   : > { %2028 = vmatpush3.bf16.msra.mxu1 %v2129_v11 }
 0x6f4   : > { %2029 = vmatprep.subr.bf16.mxu1 %v2260_v9 }
 0x6f7   : > { %2030 = vmatpush3.bf16.msra.mxu1 %v2130_v12 }
 0x6f8   : > { %2031 = vmatprep.subr.bf16.mxu1 %v2260_v9 }
 0x6fb   : > { %2032 = vmatpush3.bf16.msra.mxu1 %v2131_v13 }
 0x76e   : > { %v1408_v52 = vpop.xlane.xlu0 %1407 }
 0x76f   : > { %v1409_v53 = vmul.f32 0.03125, %v1408_v52 }
 0x771   : > { %v1410_v54 = vsub.f32 %v2612_v49, %v1409_v53 }
 0x773   : > { %v1411_v55 = vmul.f32 %v1410_v54, %v1410_v54 }
 0x775   : > { %v1412_v56 = vsel %vm731_vm1, %v1411_v55, 0.0 }
 0x776   : > { %1413 = vadd.xlane.f32.xlu1 %v1412_v56 }
 0x803   : > { %v1414_v61 = vpop.xlane.xlu1 %1413 }
 0x804   : > { %v1415_v62 = vmul.f32 0.03125, %v1414_v61 }
 0x806   : > { %v1416_v63 = vadd.f32 1e-05, %v1415_v62 }
 0x808   : > { %2158 = vrsqrt.f32 %v1416_v63 }
 0x812   : > { %v2159_v0 = vpop.eup %2158 }
 0x813   : > { %v1418_v3 = vmul.f32 %v2159_v0, %v1410_v54 }
 0x815   : > { %v1425_v5 = vmul.f32 %v1886_v2, %v1418_v3 }
 0x817   : > { %v1432_v6 = vadd.f32 %v1887_v4, %v1425_v5 }
 0x819   : > { %v1433_v7 = vpack.c.bf16 %v1432_v6, %v1432_v6 }
 0x81b   : > { %2014 = vmatmul.mubr.msk.bf16.vlgmr.msra.gmra.mrb[24].mxu0 %vm731_vm1, %v1433_v7 }
 0x8ee   : > { %v1494_v15 = vpop.f32.mrb[24].mxu0 }
 0x8ef   : > { %v1495_v16 = vadd.f32 %v1888_v14, %v1494_v15  ;;  %v2015_v18 = vpop.f32.mrb[25].mxu0 }
 0x8f0   : > { %v1497_v19 = vpop.f32.mrb[26].mxu0 }
 0x8f1   : > { %v1501_v20 = vmul.f32 0.70710677, %v1495_v16  ;;  %v2016_v21 = vpop.f32.mrb[27].mxu0  ;;  %v1500_v23 = vmul.f32 0.5, %v1495_v16 }
 0x8f3   : > { %2160 = verf.f32 %v1501_v20 }
 0x8fd   : > { %v2161_v22 = vpop.eup %2160 }
 0x8fe   : > { %v1503_v24 = vadd.f32 1.0, %v2161_v22 }
 0x900   : > { %v1504_v25 = vmul.f32 %v1503_v24, %v1500_v23 }
 0x902   : > { %v1505_v9 = vpack.c.bf16 %v1504_v25, %v1504_v25 }
 0x904   : > { %2034 = vmatmul.mubr.bf16.vlgmr.msra.gmra.mrb[16].mxu1 %v1505_v9 }
 0x9d6   : > { %1622 = sbr.rel (%p1901_p1) target bundleno = 2838 (0xb16), region = 92 }
 0x9d7   : > { %v1611_v27 = vpop.f32.mrb[16].mxu1 }
 0x9d8   : > { %v1612_v28 = vadd.f32 %v1892_v26, %v1611_v27  ;;  %v2035_v29 = vpop.f32.mrb[17].mxu1 }
 0x9d9   : > { %v1614_v30 = vpop.f32.mrb[18].mxu1 }
 0x9da   : > { %v1617_v31 = vadd.f32 %v1612_v28, %v2612_v49  ;;  %v2036_v32 = vpop.f32.mrb[19].mxu1 }
 0x9dc   : > { %1618 = vst.msk [vmem:[#allocation2] sm:$0xff] %vm731_vm1, %v1617_v31  ;;  %v1626_v33 = vsel (!%p1901_p1), %vm1625_vm7, %v1617_v31, 0.0 }
 0x9dd   : > { %1627 = vadd.xlane.f32.xlu0 %v1626_v33 }
 0xa6a   : > { %v1628_v34 = vpop.xlane.xlu0 %1627 }
 0xa6b   : > { %v1629_v35 = vmul.f32 0.03125, %v1628_v34 }
 0xa6d   : > { %v1630_v36 = vsub.f32 %v1617_v31, %v1629_v35 }
 0xa6f   : > { %v1631_v37 = vmul.f32 %v1630_v36, %v1630_v36 }
 0xa71   : > { %v1632_v38 = vsel %vm1625_vm7, %v1631_v37, 0.0 }
 0xa72   : > { %1633 = vadd.xlane.f32.xlu0 %v1632_v38 }
 0xaff   : > { %v1634_v39 = vpop.xlane.xlu0 %1633 }
 0xb00   : > { %v1635_v40 = vmul.f32 0.03125, %v1634_v39 }
 0xb02   : > { %v1636_v41 = vadd.f32 1e-05, %v1635_v40 }
 0xb04   : > { %2162 = vrsqrt.f32 %v1636_v41 }
 0xb0e   : > { %v2163_v17 = vpop.eup %2162 }
 0xb0f   : > { %v1638_v43 = vmul.f32 %v2163_v17, %v1630_v36 }
 0xb11   : > { %v1645_v45 = vmul.f32 %v1902_v42, %v1638_v43 }
 0xb13   : > { %v1652_v46 = vadd.f32 %v1903_v44, %v1645_v45 }
 0xb15   : > { %1653 = vst.msk [vmem:[%s2491_s3 - $0x7] sm:$0x80] %vm1625_vm7, %v1652_v46 }
 0xb16 PF: > { %s2792_s27 = sld [smem:[#allocation9_spill]]  ;;  %s2794_s28 = sld [smem:[#allocation25_spill]] }
 0xb17   : > { %s1667_s8 = sshll.u32 %s2491_s3, 4  ;;  %s2796_s6 = sand.u32 1, %s2234_s22   ;;  %s1668_s8 = int_to_ptr.vmem [resolvable:$true] %s1667_s8 }
 0xb18   : > { %s1655_s25 = scalar_lea.sflag [#allocation4], %s2796_s6  ;;  %s2164_s19 = scalar_lea.vmem %s1668_s8, 16 }
 0xb19   : > { %p2165_p2 = scmp.ne.s32.totalorder %s1668_s8, %s2164_s19  ;;  %s2270_s1 = smov [#allocation3]  }
 0xb1a   : > { %s2168_s17 = sshll.u32 %s2270_s1, 4  ;;  %s2169_s17 = int_to_ptr.vmem [resolvable:$false] %s2168_s17 }
 0xb1b   : > { %p2166_p4 = pnand %p2165_p2, %p2405_p3  ;;  %s2170_s21 = scalar_lea.vmem %s2169_s17, 32 }
 0xb1c   : > { %s1904_s0 = sshll.u32 %s2792_s27, 4  ;;  %s2795_s2 = smov %s2794_s28 }
 0xb1d   : > { %s2674_s5 = scalar_lea.hbm %s2794_s28, %s1904_s0  ;;  %p2167_p5 = pneg %p2166_p4 }
 0xb1e   : > { %p2171_p6 = scmp.lt.s32.totalorder %s1668_s8, %s2169_s17  ;;  %p2172_p7 = scmp.lt.s32.totalorder %s2170_s21, %s2164_s19 }
 0xb20   : > { %p2173_p8 = por %p2172_p7, %p2171_p6 }
 0xb22   : > { %p2174_p10 = pnand %p2173_p8, %p2167_p5 }
 0xb24   : > { %2177 = shalt.err (!%p2174_p10)
}
 0xb25   : > { %s2178_s3 = scalar_lea.hbm %s2674_s5, 16  ;;  %s2182_s24 = scalar_lea.hbm %s2795_s2, 32 }
 0xb26   : > { %p2179_p11 = scmp.ne.s32.totalorder %s2674_s5, %s2178_s3  ;;  %p2183_p0 = scmp.lt.u32.totalorder %s2674_s5, %s2795_s2 }
 0xb27   : > { %p2184_p1 = scmp.lt.u32.totalorder %s2182_s24, %s2178_s3  ;;  %p2186_p4 = scmp.lt.u32.totalorder %s2178_s3, %s2674_s5 }
 0xb28   : > { %p2180_p12 = pnand %p2179_p11, %p2405_p3 }
 0xb29   : > { %p2185_p2 = por %p2184_p1, %p2183_p0 }
 0xb2a   : > { %p2181_p13 = pneg %p2180_p12 }
 0xb2b   : > { %p2187_p5 = por %p2186_p4, %p2185_p2 }
 0xb2d   : > { %p2188_p6 = pnand %p2187_p5, %p2181_p13 }
 0xb2f   : > { %2191 = shalt.err (!%p2188_p6)
}
 0xb30   : > { %2037 = dma.vmem_to_hbm [thread:$0]  (%p2405_p3), %s1668_s8, 16, %s2674_s5, %s1655_s25  }
 0xb31 PF: > { %s2797_s27 = sld [smem:[#allocation12_spill]]  ;;  %s2798_s0 = sld [smem:[#allocation6_spill]] }
 0xb37   : > { %p2043_p7 = scmp.ge.s32.totalorder %s2797_s27, 2  ;;  %s1679_s26 = sand.u32 1, %s2798_s0  }
 0xb38   : > { %s1680_s28 = scalar_lea.sflag [#allocation4], %s1679_s26 }
 0xb39   : > { %p2040_p8 = pnand %p2043_p7, %p2415_p9 }
 0xb3b   : > { %2225 = dma.done.wait (!%p2040_p8), %s1680_s28, 16  }
 0xb3c   : > { %2227 = vsyncadd (!%p2040_p8), %s1680_s28, 4294967280  ;;  %s29_s28 = sadd.s32 1, %s2797_s27   ;;  %s2800_s6 = sld [smem:[#allocation7_spill]] }
 0xb3d   : > { %p26_p10 = scmp.ge.s32.totalorder %s29_s28, 6   ;;  %s2801_s23 = sld [smem:[#allocation17_spill]] }
 0xb3e   : > { %s2802_s24 = sld [smem:[#allocation10_spill]]  ;;  %s2803_s25 = sld [smem:[#allocation11_spill]] }
 0xb3f   : > { %s2804_s26 = sld [smem:[#allocation13_spill]]  ;;  %s2805_s27 = sld [smem:[#allocation15_spill]] }
 0xb40   : > { %s2806_s21 = smov %s2234_s22  ;;  %28 = sbr.rel (!%p26_p10) target bundleno = 14 (0xe), region = 163 }
 0xb42   : > { %s2807_s22 = smov %s2800_s6 }
 0xb47   :  { %1684 = vsyncpa [#allocation4], 1 }
 0xb48   :  { %1686 = vsyncpa [#allocation4 + $0x1], 1 }

</bundles_post_ra>
